<compile_context>
chip_gen: v7x
topology: tpu7x:2x2x1
jax: 0.10.0
libtpu: 0.0.40
codegen_flags: <defaults>
</compile_context>

<pallas_src>
import functools

import jax
import jax.numpy as jnp
from jax.experimental import pallas as pl
from jax.experimental.pallas import tpu as pltpu

STATE_C, STATE_H, STATE_W = 3, 21, 21
IN_FEATURES = STATE_C * STATE_H * STATE_W   # 1323 (full last dim; no K padding)
FC1_UNITS = 512
FC2_UNITS = 256
OUT_PAD = 128                               # lane-dense output width
MAX_BATCH_TILE = 256                        # keeps grid >= 2 for B >= 512
_STEP_OVERHEAD_ROWS = 96                    # ~0.35us/grid-step in "row equivalents"


def _round_up(n, m):
    return ((n + m - 1) // m) * m


def _choose_batch_tile(B):
    """Pick TB (multiple of 16, <= 256) minimizing padded rows + per-step cost."""
    best_tb, best_cost = 16, None
    for tb in range(MAX_BATCH_TILE, 15, -16):      # descending: ties keep larger TB
        bp = _round_up(B, tb)
        cost = bp + _STEP_OVERHEAD_ROWS * (bp // tb)
        if best_cost is None or cost < best_cost:
            best_tb, best_cost = tb, cost
    return best_tb


def actor_kernel(x_ref, w1_ref, b1_ref, w2_ref, b2_ref, w3_ref, b3_ref, o_ref):
    """Fused 3-layer MLP on one batch tile.

    x_ref: (TB, 1323) bf16; weights bf16; biases f32; o_ref: (TB, OUT_PAD) f32.
    MXU matmuls accumulate in f32; bias add / relu / tanh stay in f32.
    """
    x = x_ref[...]                                               # (TB, 1323) bf16

    h1 = jnp.dot(x, w1_ref[...], preferred_element_type=jnp.float32)
    h1 = jnp.maximum(h1 + b1_ref[...], 0.0)                      # (TB, 512) f32

    h2 = jnp.dot(h1.astype(jnp.bfloat16), w2_ref[...],
                 preferred_element_type=jnp.float32)
    h2 = jnp.maximum(h2 + b2_ref[...], 0.0)                      # (TB, 256) f32

    h3 = jnp.dot(h2.astype(jnp.bfloat16), w3_ref[...],
                 preferred_element_type=jnp.float32)
    o_ref[...] = jnp.tanh(h3 + b3_ref[...])                      # (TB, OUT_PAD) f32


def prepare_actor_params(params):
    """One-time weight prep (hoisted out of the per-call path).

    Casts weights to bf16 for the MXU, lane-pads fc3 (out dim) to 128 so the
    last matmul + store are lane-dense, keeps biases in f32 with shape (1, N).
    """
    w1, b1, w2, b2, w3, b3 = params
    action_size = w3.shape[-1]
    w1p = w1.astype(jnp.bfloat16)                                   # (1323, 512)
    w2p = w2.astype(jnp.bfloat16)                                   # (512, 256)
    w3p = jnp.pad(w3, ((0, 0), (0, OUT_PAD - action_size))).astype(jnp.bfloat16)
    b1p = b1.reshape(1, FC1_UNITS).astype(jnp.float32)
    b2p = b2.reshape(1, FC2_UNITS).astype(jnp.float32)
    b3p = jnp.pad(b3.reshape(1, action_size),
                  ((0, 0), (0, OUT_PAD - action_size))).astype(jnp.float32)
    return (w1p, b1p, w2p, b2p, w3p, b3p)


@functools.partial(jax.jit, static_argnames=("action_size",))
def actor_forward(state, prepped_params, *, action_size):
    """state: (B, 3, 21, 21) float32 (NCHW, same as PyTorch).

    prepped_params: output of prepare_actor_params (bf16 weights, f32 biases).
    """
    w1p, b1p, w2p, b2p, w3p, b3p = prepped_params
    B = state.shape[0]

    TB = _choose_batch_tile(B)
    B_pad = _round_up(B, TB)

    # nn.Flatten() + bf16 cast (single fused pass); pad only the batch dim.
    x = state.reshape(B, -1).astype(jnp.bfloat16)                   # (B, 1323)
    if B_pad != B:
        x = jnp.pad(x, ((0, B_pad - B), (0, 0)))

    grid = (B_pad // TB,)
    const = lambda i: (0, 0)   # weights/biases stay VMEM-resident across tiles

    flops = 2 * B_pad * (IN_FEATURES * FC1_UNITS
                         + FC1_UNITS * FC2_UNITS
                         + FC2_UNITS * OUT_PAD)
    bytes_accessed = (
        x.size * 2
        + (w1p.size + w2p.size + w3p.size) * 2
        + (b1p.size + b2p.size + b3p.size) * 4
        + B_pad * OUT_PAD * 4)

    out = pl.pallas_call(
        actor_kernel,
        out_shape=jax.ShapeDtypeStruct((B_pad, OUT_PAD), jnp.float32),
        grid=grid,
        in_specs=[
            pl.BlockSpec((TB, IN_FEATURES), lambda i: (i, 0)),      # x (batch-tiled)
            pl.BlockSpec((IN_FEATURES, FC1_UNITS), const),          # w1
            pl.BlockSpec((1, FC1_UNITS), const),                    # b1
            pl.BlockSpec((FC1_UNITS, FC2_UNITS), const),            # w2
            pl.BlockSpec((1, FC2_UNITS), const),                    # b2
            pl.BlockSpec((FC2_UNITS, OUT_PAD), const),              # w3
            pl.BlockSpec((1, OUT_PAD), const),                      # b3
        ],
        out_specs=pl.BlockSpec((TB, OUT_PAD), lambda i: (i, 0)),
        compiler_params=pltpu.CompilerParams(
            dimension_semantics=("parallel",)),
        cost_estimate=pl.CostEstimate(
            flops=flops,
            transcendentals=B_pad * OUT_PAD,
            bytes_accessed=bytes_accessed),
    )(x, w1p, b1p, w2p, b2p, w3p, b3p)

    # Strip batch + lane padding.
    return out[:B, :action_size]


def init_actor_params(key, action_size):
    """Deterministic init mirroring Actor.reset_parameters / PyTorch defaults.

    PyTorch Linear weight is (out, in); we store the transpose (in, out) so the
    kernel can do x @ W directly.
    """
    k = jax.random.split(key, 6)
    # hidden_init uses weight.size()[0] == out_features (faithful to the module).
    lim1 = 1.0 / jnp.sqrt(jnp.float32(FC1_UNITS))
    lim2 = 1.0 / jnp.sqrt(jnp.float32(FC2_UNITS))
    lim3 = 0.003

    w1 = jax.random.uniform(k[0], (IN_FEATURES, FC1_UNITS), jnp.float32, -lim1, lim1)
    b1 = jax.random.uniform(
        k[1], (1, FC1_UNITS), jnp.float32,
        -1.0 / jnp.sqrt(jnp.float32(IN_FEATURES)), 1.0 / jnp.sqrt(jnp.float32(IN_FEATURES)))

    w2 = jax.random.uniform(k[2], (FC1_UNITS, FC2_UNITS), jnp.float32, -lim2, lim2)
    b2 = jax.random.uniform(
        k[3], (1, FC2_UNITS), jnp.float32,
        -1.0 / jnp.sqrt(jnp.float32(FC1_UNITS)), 1.0 / jnp.sqrt(jnp.float32(FC1_UNITS)))

    w3 = jax.random.uniform(k[4], (FC2_UNITS, action_size), jnp.float32, -lim3, lim3)
    b3 = jax.random.uniform(
        k[5], (1, action_size), jnp.float32,
        -1.0 / jnp.sqrt(jnp.float32(FC2_UNITS)), 1.0 / jnp.sqrt(jnp.float32(FC2_UNITS)))

    return (w1, b1, w2, b2, w3, b3)


def actor_ref(state, params):
    """Pure-JAX f32 reference for correctness check."""
    w1, b1, w2, b2, w3, b3 = params
    x = state.reshape(state.shape[0], -1).astype(jnp.float32)
    h1 = jax.nn.relu(x @ w1 + b1)
    h2 = jax.nn.relu(h1 @ w2 + b2)
    return jnp.tanh(h2 @ w3 + b3)


if __name__ == "__main__":
    key = jax.random.PRNGKey(0)
    k_state, k_params = jax.random.split(key)

    batch = 2
    action_size = 4

    state = jax.random.normal(k_state, (batch, STATE_C, STATE_H, STATE_W), jnp.float32)
    params = init_actor_params(k_params, action_size)

    # Weight prep happens ONCE, outside the per-call forward path.
    prepped = prepare_actor_params(params)
    prepped = jax.tree_util.tree_map(jax.block_until_ready, prepped)

    out = actor_forward(state, prepped, action_size=action_size)
    out = jax.block_until_ready(out)

    ref = actor_ref(state, params)
    assert out.shape == (batch, action_size), out.shape
    # bf16 matmul inputs (f32 accumulate) vs f32 reference -> loosened tolerance.
    assert jnp.allclose(out, ref, atol=2e-2, rtol=2e-2), jnp.max(jnp.abs(out - ref))

    print("KERNEL_OK")
</pallas_src>

<mosaic_0001>
module attributes {stable_mosaic.version = 11 : i64} {
  func.func @actor_kernel(%arg0: i32, %arg1: memref<16x1323xbf16, #tpu.memory_space<vmem>>, %arg2: memref<1323x512xbf16, #tpu.memory_space<vmem>>, %arg3: memref<1x512xf32, #tpu.memory_space<vmem>>, %arg4: memref<512x256xbf16, #tpu.memory_space<vmem>>, %arg5: memref<1x256xf32, #tpu.memory_space<vmem>>, %arg6: memref<256x128xbf16, #tpu.memory_space<vmem>>, %arg7: memref<1x128xf32, #tpu.memory_space<vmem>>, %arg8: memref<16x128xf32, #tpu.memory_space<vmem>>) attributes {dimension_semantics = [#tpu.dimension_semantics<parallel>], iteration_bounds = array<i64: 1>, scalar_prefetch = 0 : i64, scratch_operands = 0 : i64, tpu.core_type = #tpu.core_type<tc>, window_params = [{transform_indices = @transform_0, window_bounds = array<i64: 16, 1323>}, {pipeline_mode = #tpu.pipeline_mode<synchronous>, transform_indices = @transform_1, window_bounds = array<i64: 1323, 512>}, {pipeline_mode = #tpu.pipeline_mode<synchronous>, transform_indices = @transform_2, window_bounds = array<i64: 1, 512>}, {pipeline_mode = #tpu.pipeline_mode<synchronous>, transform_indices = @transform_3, window_bounds = array<i64: 512, 256>}, {pipeline_mode = #tpu.pipeline_mode<synchronous>, transform_indices = @transform_4, window_bounds = array<i64: 1, 256>}, {pipeline_mode = #tpu.pipeline_mode<synchronous>, transform_indices = @transform_5, window_bounds = array<i64: 256, 128>}, {pipeline_mode = #tpu.pipeline_mode<synchronous>, transform_indices = @transform_6, window_bounds = array<i64: 1, 128>}, {transform_indices = @transform_7, window_bounds = array<i64: 16, 128>}]} {
    %c0 = arith.constant 0 : index
    %c0_0 = arith.constant 0 : index
    %0 = vector.load %arg1[%c0, %c0_0] : memref<16x1323xbf16, #tpu.memory_space<vmem>>, vector<16x1323xbf16>
    %c0_1 = arith.constant 0 : index
    %c0_2 = arith.constant 0 : index
    %1 = vector.load %arg2[%c0_1, %c0_2] : memref<1323x512xbf16, #tpu.memory_space<vmem>>, vector<1323x512xbf16>
    %cst = arith.constant dense<0.000000e+00> : vector<16x512xf32>
    %2 = tpu.matmul %0, %1, %cst {dimension_numbers = #tpu.dot_dimension_numbers<[1], [0], [0], [1], [0, 0, 1, 1], [], []>} : vector<16x1323xbf16>, vector<1323x512xbf16>, vector<16x512xf32> -> vector<16x512xf32>
    %c0_3 = arith.constant 0 : index
    %c0_4 = arith.constant 0 : index
    %3 = vector.load %arg3[%c0_3, %c0_4] : memref<1x512xf32, #tpu.memory_space<vmem>>, vector<1x512xf32>
    %4 = vector.broadcast %3 : vector<1x512xf32> to vector<16x512xf32>
    %5 = arith.addf %2, %4 : vector<16x512xf32>
    %cst_5 = arith.constant 0.000000e+00 : f32
    %6 = vector.broadcast %cst_5 : f32 to vector<16x512xf32>
    %7 = arith.maximumf %5, %6 : vector<16x512xf32>
    %8 = arith.truncf %7 : vector<16x512xf32> to vector<16x512xbf16>
    %c0_6 = arith.constant 0 : index
    %c0_7 = arith.constant 0 : index
    %9 = vector.load %arg4[%c0_6, %c0_7] : memref<512x256xbf16, #tpu.memory_space<vmem>>, vector<512x256xbf16>
    %cst_8 = arith.constant dense<0.000000e+00> : vector<16x256xf32>
    %10 = tpu.matmul %8, %9, %cst_8 {dimension_numbers = #tpu.dot_dimension_numbers<[1], [0], [0], [1], [0, 0, 1, 1], [], []>} : vector<16x512xbf16>, vector<512x256xbf16>, vector<16x256xf32> -> vector<16x256xf32>
    %c0_9 = arith.constant 0 : index
    %c0_10 = arith.constant 0 : index
    %11 = vector.load %arg5[%c0_9, %c0_10] : memref<1x256xf32, #tpu.memory_space<vmem>>, vector<1x256xf32>
    %12 = vector.broadcast %11 : vector<1x256xf32> to vector<16x256xf32>
    %13 = arith.addf %10, %12 : vector<16x256xf32>
    %cst_11 = arith.constant 0.000000e+00 : f32
    %14 = vector.broadcast %cst_11 : f32 to vector<16x256xf32>
    %15 = arith.maximumf %13, %14 : vector<16x256xf32>
    %16 = arith.truncf %15 : vector<16x256xf32> to vector<16x256xbf16>
    %c0_12 = arith.constant 0 : index
    %c0_13 = arith.constant 0 : index
    %17 = vector.load %arg6[%c0_12, %c0_13] : memref<256x128xbf16, #tpu.memory_space<vmem>>, vector<256x128xbf16>
    %cst_14 = arith.constant dense<0.000000e+00> : vector<16x128xf32>
    %18 = tpu.matmul %16, %17, %cst_14 {dimension_numbers = #tpu.dot_dimension_numbers<[1], [0], [0], [1], [0, 0, 1, 1], [], []>} : vector<16x256xbf16>, vector<256x128xbf16>, vector<16x128xf32> -> vector<16x128xf32>
    %c0_15 = arith.constant 0 : index
    %c0_16 = arith.constant 0 : index
    %19 = vector.load %arg7[%c0_15, %c0_16] : memref<1x128xf32, #tpu.memory_space<vmem>>, vector<1x128xf32>
    %20 = vector.broadcast %19 : vector<1x128xf32> to vector<16x128xf32>
    %21 = arith.addf %18, %20 : vector<16x128xf32>
    %22 = math.tanh %21 : vector<16x128xf32>
    %c0_17 = arith.constant 0 : index
    %c0_18 = arith.constant 0 : index
    %23 = vector.load %arg8[%c0_17, %c0_18] : memref<16x128xf32, #tpu.memory_space<vmem>>, vector<16x128xf32>
    tpu.vector_store %arg8[%c0_17, %c0_18], %22 {strides = array<i32>} : memref<16x128xf32, #tpu.memory_space<vmem>>, vector<16x128xf32>,
    return
  }
  func.func @transform_0(%arg0: i32) -> (i32, i32) {
    %c0_i32 = arith.constant 0 : i32
    %c0_i32_0 = arith.constant 0 : i32
    return %arg0, %c0_i32 : i32, i32
  }
  func.func @transform_1(%arg0: i32) -> (i32, i32) {
    %c0_i32 = arith.constant 0 : i32
    %c0_i32_0 = arith.constant 0 : i32
    %c0_i32_1 = arith.constant 0 : i32
    return %c0_i32, %c0_i32_0 : i32, i32
  }
  func.func @transform_2(%arg0: i32) -> (i32, i32) {
    %c0_i32 = arith.constant 0 : i32
    %c0_i32_0 = arith.constant 0 : i32
    %c0_i32_1 = arith.constant 0 : i32
    return %c0_i32, %c0_i32_0 : i32, i32
  }
  func.func @transform_3(%arg0: i32) -> (i32, i32) {
    %c0_i32 = arith.constant 0 : i32
    %c0_i32_0 = arith.constant 0 : i32
    %c0_i32_1 = arith.constant 0 : i32
    return %c0_i32, %c0_i32_0 : i32, i32
  }
  func.func @transform_4(%arg0: i32) -> (i32, i32) {
    %c0_i32 = arith.constant 0 : i32
    %c0_i32_0 = arith.constant 0 : i32
    %c0_i32_1 = arith.constant 0 : i32
    return %c0_i32, %c0_i32_0 : i32, i32
  }
  func.func @transform_5(%arg0: i32) -> (i32, i32) {
    %c0_i32 = arith.constant 0 : i32
    %c0_i32_0 = arith.constant 0 : i32
    %c0_i32_1 = arith.constant 0 : i32
    return %c0_i32, %c0_i32_0 : i32, i32
  }
  func.func @transform_6(%arg0: i32) -> (i32, i32) {
    %c0_i32 = arith.constant 0 : i32
    %c0_i32_0 = arith.constant 0 : i32
    %c0_i32_1 = arith.constant 0 : i32
    return %c0_i32, %c0_i32_0 : i32, i32
  }
  func.func @transform_7(%arg0: i32) -> (i32, i32) {
    %c0_i32 = arith.constant 0 : i32
    %c0_i32_0 = arith.constant 0 : i32
    return %arg0, %c0_i32 : i32, i32
  }
}

</mosaic_0001>

<bundles_post_ra>
// kernel: actor_forward.1
= control target key start
LH: loop header
LB: loop body
LE: loop exit
PB: predicated region body
PF: predicated region fallthrough
CT: control target
= control target key end

     0   :  { %12 = vsyncpa [#allocation3], 0  ;;  %s4945_s0 = inlined_call_operand.vmem [shape: bf16[16,1323], index: 0, kind: input, shape index: {}]   ;;  %s4946_s1 = inlined_call_operand.hbm [shape: bf16[1323,512], index: 1, kind: input, shape index: {}]   ;;  %s4947_s2 = inlined_call_operand.hbm [shape: f32[1,512], index: 2, kind: input, shape index: {}]   ;;  %s4948_s3 = inlined_call_operand.hbm [shape: bf16[512,256], index: 3, kind: input, shape index: {}]   ;;  %s4949_s4 = inlined_call_operand.hbm [shape: f32[1,256], index: 4, kind: input, shape index: {}]   ;;  %s4950_s5 = inlined_call_operand.hbm [shape: bf16[256,128], index: 5, kind: input, shape index: {}]   ;;  %s4951_s6 = inlined_call_operand.hbm [shape: f32[1,128], index: 6, kind: input, shape index: {}]   ;;  %s4952_s7 = inlined_call_operand.vmem [shape: f32[16,128], index: 7, kind: output, shape index: {}]  }
   0x1   :  { %13 = vsyncpa [#allocation5], 0 }
   0x2   :  { %14 = vsyncpa [#allocation8], 0 }
   0x3   :  { %15 = vsyncpa [#allocation11], 0  ;;  %s4693_s24 = smov [#allocation4]   ;;  %s4694_s26 = smov [#allocation7]  }
   0x4   :  { %s36_s25 = sshll.u32 %s4693_s24, 4  ;;  %s58_s27 = sshll.u32 %s4694_s26, 4  ;;  %s37_s25 = int_to_ptr.vmem [resolvable:$true] %s36_s25  ;;  %s59_s27 = int_to_ptr.vmem [resolvable:$true] %s58_s27 }
   0x5   :  { %s4553_s30 = scalar_lea.hbm %s4947_s2, 64 }
   0x6   :  { %p4554_p0 = scmp.ne.s32.totalorder %s4947_s2, %s4553_s30  ;;  %p4557_p1 = scmp.lt.u32.totalorder %s4553_s30, %s4947_s2 }
   0x8   :  { %p4559_p2 = pnand %p4557_p1, %p4554_p0 }
   0xa   :  { %4562 = shalt.err (!%p4559_p2)
}
   0xb   :  { %s4563_s12 = scalar_lea.vmem %s37_s25, 64  ;;  %p4568_p4 = scmp.lt.s32.totalorder %s37_s25, %s37_s25 }
   0xc   :  { %p4564_p3 = scmp.ne.s32.totalorder %s37_s25, %s4563_s12  ;;  %p4569_p5 = scmp.lt.s32.totalorder %s4563_s12, %s4563_s12 }
   0xe   :  { %p4570_p6 = por %p4569_p5, %p4568_p4 }
  0x10   :  { %p4571_p7 = pnand %p4570_p6, %p4564_p3 }
  0x12   :  { %4574 = shalt.err (!%p4571_p7)
}
  0x13   :  { %39 = dma.hbm_to_vmem [thread:$0]  %s4947_s2, 64, %s37_s25, [#allocation5]  }
  0x14   :  { %s4575_s17 = scalar_lea.hbm %s4949_s4, 32 }
  0x15   :  { %p4576_p8 = scmp.ne.s32.totalorder %s4949_s4, %s4575_s17  ;;  %p4579_p9 = scmp.lt.u32.totalorder %s4575_s17, %s4949_s4 }
  0x17   :  { %p4581_p10 = pnand %p4579_p9, %p4576_p8 }
  0x19   :  { %4584 = shalt.err (!%p4581_p10)
}
  0x1a   :  { %s4585_s22 = scalar_lea.vmem %s59_s27, 32  ;;  %p4590_p12 = scmp.lt.s32.totalorder %s59_s27, %s59_s27 }
  0x1b   :  { %p4586_p11 = scmp.ne.s32.totalorder %s59_s27, %s4585_s22  ;;  %p4591_p13 = scmp.lt.s32.totalorder %s4585_s22, %s4585_s22 }
  0x1d   :  { %p4592_p0 = por %p4591_p13, %p4590_p12 }
  0x1f   :  { %p4593_p1 = pnand %p4592_p0, %p4586_p11 }
  0x21   :  { %4596 = shalt.err (!%p4593_p1)
}
  0x22   :  { %61 = dma.hbm_to_vmem [thread:$0]  %s4949_s4, 32, %s59_s27, [#allocation8]  }
  0x23   :  { %s4695_s24 = smov [#allocation2]   ;;  %s4597_s29 = scalar_lea.hbm %s4946_s1, 42496 }
  0x24   :  { %s23_s25 = sshll.u32 %s4695_s24, 4  ;;  %p4598_p2 = scmp.ne.s32.totalorder %s4946_s1, %s4597_s29  ;;  %s24_s25 = int_to_ptr.vmem [resolvable:$true] %s23_s25 }
  0x25   :  { %p4601_p3 = scmp.lt.u32.totalorder %s4597_s29, %s4946_s1 }
  0x27   :  { %p4603_p4 = pnand %p4601_p3, %p4598_p2 }
  0x29   :  { %4606 = shalt.err (!%p4603_p4)
}
  0x2a   :  { %s4607_s11 = scalar_lea.vmem %s24_s25, 42496  ;;  %p4612_p6 = scmp.lt.s32.totalorder %s24_s25, %s24_s25 }
  0x2b   :  { %p4608_p5 = scmp.ne.s32.totalorder %s24_s25, %s4607_s11  ;;  %p4613_p7 = scmp.lt.s32.totalorder %s4607_s11, %s4607_s11 }
  0x2d   :  { %p4614_p8 = por %p4613_p7, %p4612_p6 }
  0x2f   :  { %p4615_p9 = pnand %p4614_p8, %p4608_p5 }
  0x31   :  { %4618 = shalt.err (!%p4615_p9)
}
  0x32   :  { %s4696_s4 = smov 256   ;;  %s4697_s27 = smov 16  }
  0x33   :  { %29 = dma.hbm_to_vmem [thread:$0]  %s4946_s1, 42496, %s24_s25, [#allocation3], %s4696_s4, %s4696_s4, %s4697_s27  }
  0x34   :  { %s4698_s14 = smov [#allocation6]   ;;  %s4619_s18 = scalar_lea.hbm %s4948_s3, 8192 }
  0x35   :  { %s45_s15 = sshll.u32 %s4698_s14, 4  ;;  %p4620_p10 = scmp.ne.s32.totalorder %s4948_s3, %s4619_s18  ;;  %s46_s15 = int_to_ptr.vmem [resolvable:$true] %s45_s15 }
  0x36   :  { %p4623_p11 = scmp.lt.u32.totalorder %s4619_s18, %s4948_s3 }
  0x38   :  { %p4625_p12 = pnand %p4623_p11, %p4620_p10 }
  0x3a   :  { %4628 = shalt.err (!%p4625_p12)
}
  0x3b   :  { %s4629_s2 = scalar_lea.vmem %s46_s15, 8192  ;;  %p4634_p0 = scmp.lt.s32.totalorder %s46_s15, %s46_s15 }
  0x3c   :  { %p4630_p13 = scmp.ne.s32.totalorder %s46_s15, %s4629_s2  ;;  %p4635_p1 = scmp.lt.s32.totalorder %s4629_s2, %s4629_s2 }
  0x3e   :  { %p4636_p2 = por %p4635_p1, %p4634_p0 }
  0x40   :  { %p4637_p3 = pnand %p4636_p2, %p4630_p13 }
  0x42   :  { %4640 = shalt.err (!%p4637_p3)
}
  0x43   :  { %s4699_s1 = smov 128   ;;  %s4700_s23 = smov 8  }
  0x44   :  { %51 = dma.hbm_to_vmem [thread:$0]  %s4948_s3, 8192, %s46_s15, [#allocation5], %s4699_s1, %s4699_s1, %s4700_s23  }
  0x45   :  { %s4701_s26 = smov [#allocation9]   ;;  %s4641_s8 = scalar_lea.hbm %s4950_s5, 2048 }
  0x46   :  { %s67_s28 = sshll.u32 %s4701_s26, 4  ;;  %p4642_p4 = scmp.ne.s32.totalorder %s4950_s5, %s4641_s8  ;;  %s68_s28 = int_to_ptr.vmem [resolvable:$true] %s67_s28 }
  0x47   :  { %p4645_p5 = scmp.lt.u32.totalorder %s4641_s8, %s4950_s5 }
  0x49   :  { %p4647_p6 = pnand %p4645_p5, %p4642_p4 }
  0x4b   :  { %4650 = shalt.err (!%p4647_p6)
}
  0x4c   :  { %s4651_s27 = scalar_lea.vmem %s68_s28, 2048  ;;  %p4656_p8 = scmp.lt.s32.totalorder %s68_s28, %s68_s28 }
  0x4d   :  { %p4652_p7 = scmp.ne.s32.totalorder %s68_s28, %s4651_s27  ;;  %p4657_p9 = scmp.lt.s32.totalorder %s4651_s27, %s4651_s27 }
  0x4f   :  { %p4658_p10 = por %p4657_p9, %p4656_p8 }
  0x51   :  { %p4659_p11 = pnand %p4658_p10, %p4652_p7 }
  0x53   :  { %4662 = shalt.err (!%p4659_p11)
}
  0x54   :  { %s4702_s3 = smov 64   ;;  %s4703_s12 = smov 4  }
  0x55   :  { %73 = dma.hbm_to_vmem [thread:$0]  %s4950_s5, 2048, %s68_s28, [#allocation8], %s4702_s3, %s4702_s3, %s4703_s12  }
  0x56   :  { %s4704_s15 = smov [#allocation10]   ;;  %s4663_s19 = scalar_lea.hbm %s4951_s6, 16 }
  0x57   :  { %s80_s16 = sshll.u32 %s4704_s15, 4  ;;  %p4664_p12 = scmp.ne.s32.totalorder %s4951_s6, %s4663_s19  ;;  %s81_s16 = int_to_ptr.vmem [resolvable:$true] %s80_s16 }
  0x58   :  { %p4667_p13 = scmp.lt.u32.totalorder %s4663_s19, %s4951_s6 }
  0x5a   :  { %p4669_p0 = pnand %p4667_p13, %p4664_p12 }
  0x5c   :  { %4672 = shalt.err (!%p4669_p0)
}
  0x5d   :  { %s4673_s1 = scalar_lea.vmem %s81_s16, 16  ;;  %s4677_s5 = scalar_lea.vmem %s81_s16, 32 }
  0x5e   :  { %p4674_p1 = scmp.ne.s32.totalorder %s81_s16, %s4673_s1  ;;  %p4678_p2 = scmp.lt.s32.totalorder %s81_s16, %s81_s16 }
  0x5f   :  { %p4679_p3 = scmp.lt.s32.totalorder %s4677_s5, %s4673_s1 }
  0x61   :  { %p4680_p4 = por %p4679_p3, %p4678_p2 }
  0x63   :  { %p4681_p5 = pnand %p4680_p4, %p4674_p1 }
  0x65   :  { %4684 = shalt.err (!%p4681_p5)
}
  0x66   :  { %83 = dma.hbm_to_vmem [thread:$0]  %s4951_s6, 16, %s81_s16, [#allocation11]  }
  0x67   :  { %4685 = dma.done.wait [#allocation3], 42496  }
  0x68   :  { %4686 = vsyncadd [#allocation3], 4294924800 }
  0x69   :  { %4687 = dma.done.wait [#allocation5], 8256  }
  0x6a   :  { %4688 = vsyncadd [#allocation5], 4294959040 }
  0x6b   :  { %4689 = dma.done.wait [#allocation8], 2080  }
  0x6c   :  { %4690 = vsyncadd [#allocation8], 4294965216 }
  0x6d   :  { %4691 = dma.done.wait [#allocation11], 16  }
  0x6e   :  { %4692 = vsyncadd [#allocation11], 4294967280  ;;  %v3922_v0 = vld [vmem:[#allocation2 + $0x4] ss:$16 sps:$4 sm:$0xff]   ;;  %v3926_v2 = vld [vmem:[#allocation2] ss:$16 sps:$4 sm:$0xff]  }
  0x6f   :  { %v3924_v1 = vld [vmem:[#allocation2 + $0x204] ss:$16 sps:$4 sm:$0xff]   ;;  %2200 = vmatprep.subr.bf16.mxu1 %v3922_v0  ;;  %v3927_v3 = vld [vmem:[#allocation2 + $0x200] ss:$16 sps:$4 sm:$0xff]   ;;  %v4825_v51 = vld [vmem:[%s4945_s0 + $0xc] ss:$44 sps:$4 sm:$0xff]  }
  0x70   :  { %2243 = vmatprep.subr.bf16.mxu0 %v3924_v1  ;;  %v3928_v4 = vld [vmem:[#allocation2 + $0x24] ss:$16 sps:$4 sm:$0xff]   ;;  %2201 = vmatpush1.bf16.msra.mxu1 %v3926_v2  ;;  %v3932_v6 = vld [vmem:[#allocation2 + $0x20] ss:$16 sps:$4 sm:$0xff]   ;;  %vm2184_vm0 = vcmask 1044480   ;;  %vm2185_vm1 = vcmask 1045504  }
  0x71   :  { %2244 = vmatpush1.bf16.msra.mxu0 %v3927_v3  ;;  %v3930_v5 = vld [vmem:[#allocation2 + $0x224] ss:$16 sps:$4 sm:$0xff]   ;;  %2202 = vmatprep.subr.bf16.mxu1 %v3928_v4  ;;  %v3933_v7 = vld [vmem:[#allocation2 + $0x220] ss:$16 sps:$4 sm:$0xff]   ;;  %v4029_v3 = vld [vmem:[#allocation2 + $0xc] ss:$16 sps:$4 sm:$0xff]  }
  0x72   :  { %2245 = vmatprep.subr.bf16.mxu0 %v3930_v5  ;;  %v3934_v8 = vld [vmem:[#allocation2 + $0x44] ss:$16 sps:$4 sm:$0xff]   ;;  %v3938_v10 = vld [vmem:[#allocation2 + $0x40] ss:$16 sps:$4 sm:$0xff]   ;;  %2275 = vmatprep.mubr.bf16.mxu0 %v4825_v51  ;;  %vm2180_vm2 = vcmask 351232  }
  0x73   :  { %v3936_v9 = vld [vmem:[#allocation2 + $0x244] ss:$16 sps:$4 sm:$0xff]   ;;  %v3939_v11 = vld [vmem:[#allocation2 + $0x240] ss:$16 sps:$4 sm:$0xff]  }
  0x74   :  { %2203 = vmatpush1.bf16.msra.mxu1 %v3932_v6  ;;  %v3940_v12 = vld [vmem:[#allocation2 + $0x64] ss:$16 sps:$4 sm:$0xff]   ;;  %v3944_v14 = vld [vmem:[#allocation2 + $0x60] ss:$16 sps:$4 sm:$0xff]  }
  0x75   :  { %2246 = vmatpush1.bf16.msra.mxu0 %v3933_v7  ;;  %2204 = vmatprep.subr.bf16.mxu1 %v3934_v8  ;;  %v3942_v13 = vld [vmem:[#allocation2 + $0x264] ss:$16 sps:$4 sm:$0xff]   ;;  %v3945_v15 = vld [vmem:[#allocation2 + $0x260] ss:$16 sps:$4 sm:$0xff]   ;;  %v4027_v7 = vld [vmem:[#allocation2 + $0x8] ss:$16 sps:$4 sm:$0xff]  }
  0x76   :  { %2247 = vmatprep.subr.bf16.mxu0 %v3936_v9  ;;  %v3946_v16 = vld [vmem:[#allocation2 + $0x84] ss:$16 sps:$4 sm:$0xff]   ;;  %v3950_v18 = vld [vmem:[#allocation2 + $0x80] ss:$16 sps:$4 sm:$0xff]   ;;  %v4035_v9 = vld [vmem:[#allocation2 + $0x2c] ss:$16 sps:$4 sm:$0xff]  }
  0x77   :  { %v3948_v17 = vld [vmem:[#allocation2 + $0x284] ss:$16 sps:$4 sm:$0xff]   ;;  %v3951_v19 = vld [vmem:[#allocation2 + $0x280] ss:$16 sps:$4 sm:$0xff]  }
  0x78   :  { %2205 = vmatpush1.bf16.msra.mxu1 %v3938_v10  ;;  %v3952_v20 = vld [vmem:[#allocation2 + $0xa4] ss:$16 sps:$4 sm:$0xff]   ;;  %v3956_v22 = vld [vmem:[#allocation2 + $0xa0] ss:$16 sps:$4 sm:$0xff]  }
  0x79   :  { %2248 = vmatpush1.bf16.msra.mxu0 %v3939_v11  ;;  %2206 = vmatprep.subr.bf16.mxu1 %v3940_v12  ;;  %v3954_v21 = vld [vmem:[#allocation2 + $0x2a4] ss:$16 sps:$4 sm:$0xff]   ;;  %v3957_v23 = vld [vmem:[#allocation2 + $0x2a0] ss:$16 sps:$4 sm:$0xff]   ;;  %v4033_v11 = vld [vmem:[#allocation2 + $0x28] ss:$16 sps:$4 sm:$0xff]  }
  0x7a   :  { %2249 = vmatprep.subr.bf16.mxu0 %v3942_v13  ;;  %v3958_v24 = vld [vmem:[#allocation2 + $0xc4] ss:$16 sps:$4 sm:$0xff]   ;;  %v3962_v26 = vld [vmem:[#allocation2 + $0xc0] ss:$16 sps:$4 sm:$0xff]   ;;  %v4041_v13 = vld [vmem:[#allocation2 + $0x4c] ss:$16 sps:$4 sm:$0xff]  }
  0x7b   :  { %v3960_v25 = vld [vmem:[#allocation2 + $0x2c4] ss:$16 sps:$4 sm:$0xff]   ;;  %v3963_v27 = vld [vmem:[#allocation2 + $0x2c0] ss:$16 sps:$4 sm:$0xff]  }
  0x7c   :  { %2207 = vmatpush1.bf16.msra.mxu1 %v3944_v14  ;;  %v3964_v28 = vld [vmem:[#allocation2 + $0xe4] ss:$16 sps:$4 sm:$0xff]   ;;  %v3968_v30 = vld [vmem:[#allocation2 + $0xe0] ss:$16 sps:$4 sm:$0xff]  }
  0x7d   :  { %2250 = vmatpush1.bf16.msra.mxu0 %v3945_v15  ;;  %2208 = vmatprep.subr.bf16.mxu1 %v3946_v16  ;;  %v3966_v29 = vld [vmem:[#allocation2 + $0x2e4] ss:$16 sps:$4 sm:$0xff]   ;;  %v3969_v31 = vld [vmem:[#allocation2 + $0x2e0] ss:$16 sps:$4 sm:$0xff]   ;;  %v4039_v15 = vld [vmem:[#allocation2 + $0x48] ss:$16 sps:$4 sm:$0xff]  }
  0x7e   :  { %2251 = vmatprep.subr.bf16.mxu0 %v3948_v17  ;;  %v3970_v32 = vld [vmem:[#allocation2 + $0x104] ss:$16 sps:$4 sm:$0xff]   ;;  %v3974_v34 = vld [vmem:[#allocation2 + $0x100] ss:$16 sps:$4 sm:$0xff]   ;;  %v4047_v17 = vld [vmem:[#allocation2 + $0x6c] ss:$16 sps:$4 sm:$0xff]  }
  0x7f   :  { %v3972_v33 = vld [vmem:[#allocation2 + $0x304] ss:$16 sps:$4 sm:$0xff]   ;;  %v3975_v35 = vld [vmem:[#allocation2 + $0x300] ss:$16 sps:$4 sm:$0xff]  }
  0x80   :  { %2209 = vmatpush1.bf16.msra.mxu1 %v3950_v18  ;;  %v3976_v36 = vld [vmem:[#allocation2 + $0x124] ss:$16 sps:$4 sm:$0xff]   ;;  %v3980_v38 = vld [vmem:[#allocation2 + $0x120] ss:$16 sps:$4 sm:$0xff]  }
  0x81   :  { %2252 = vmatpush1.bf16.msra.mxu0 %v3951_v19  ;;  %2210 = vmatprep.subr.bf16.mxu1 %v3952_v20  ;;  %v3978_v37 = vld [vmem:[#allocation2 + $0x324] ss:$16 sps:$4 sm:$0xff]   ;;  %v3981_v39 = vld [vmem:[#allocation2 + $0x320] ss:$16 sps:$4 sm:$0xff]   ;;  %v4045_v19 = vld [vmem:[#allocation2 + $0x68] ss:$16 sps:$4 sm:$0xff]  }
  0x82   :  { %2253 = vmatprep.subr.bf16.mxu0 %v3954_v21  ;;  %v3982_v40 = vld [vmem:[#allocation2 + $0x144] ss:$16 sps:$4 sm:$0xff]   ;;  %v3986_v42 = vld [vmem:[#allocation2 + $0x140] ss:$16 sps:$4 sm:$0xff]   ;;  %v4053_v21 = vld [vmem:[#allocation2 + $0x8c] ss:$16 sps:$4 sm:$0xff]  }
  0x83   :  { %v3984_v41 = vld [vmem:[#allocation2 + $0x344] ss:$16 sps:$4 sm:$0xff]   ;;  %v3987_v43 = vld [vmem:[#allocation2 + $0x340] ss:$16 sps:$4 sm:$0xff]  }
  0x84   :  { %2211 = vmatpush1.bf16.msra.mxu1 %v3956_v22  ;;  %v3988_v44 = vld [vmem:[#allocation2 + $0x164] ss:$16 sps:$4 sm:$0xff]   ;;  %v3992_v46 = vld [vmem:[#allocation2 + $0x160] ss:$16 sps:$4 sm:$0xff]  }
  0x85   :  { %2254 = vmatpush1.bf16.msra.mxu0 %v3957_v23  ;;  %2212 = vmatprep.subr.bf16.mxu1 %v3958_v24  ;;  %v3990_v45 = vld [vmem:[#allocation2 + $0x364] ss:$16 sps:$4 sm:$0xff]   ;;  %v3993_v47 = vld [vmem:[#allocation2 + $0x360] ss:$16 sps:$4 sm:$0xff]   ;;  %v4051_v23 = vld [vmem:[#allocation2 + $0x88] ss:$16 sps:$4 sm:$0xff]  }
  0x86   :  { %2255 = vmatprep.subr.bf16.mxu0 %v3960_v25  ;;  %v3994_v48 = vld [vmem:[#allocation2 + $0x184] ss:$16 sps:$4 sm:$0xff]   ;;  %v3998_v52 = vld [vmem:[#allocation2 + $0x180] ss:$16 sps:$4 sm:$0xff]   ;;  %v4059_v25 = vld [vmem:[#allocation2 + $0xac] ss:$16 sps:$4 sm:$0xff]  }
  0x87   :  { %v4020_v49 = vld [vmem:[%s4945_s0 + $0x4] ss:$44 sps:$4 sm:$0xff]   ;;  %v4831_v4 = vld [vmem:[%s4945_s0] ss:$44 sps:$4 sm:$0xff]   ;;  %v4836_v5 = vld [vmem:[%s4945_s0 + $0x8] ss:$44 sps:$4 sm:$0xff]  }
  0x88   :  { %2213 = vmatpush1.bf16.msra.mxu1 %v3962_v26  ;;  %v3996_v50 = vld [vmem:[#allocation2 + $0x384] ss:$16 sps:$4 sm:$0xff]   ;;  %2232 = vmatprep.mubr.bf16.mxu1 %v4020_v49  ;;  %v3999_v53 = vld [vmem:[#allocation2 + $0x380] ss:$16 sps:$4 sm:$0xff]  }
  0x89   :  { %2256 = vmatpush1.bf16.msra.mxu0 %v3963_v27  ;;  %2214 = vmatprep.subr.bf16.mxu1 %v3964_v28  ;;  %v4000_v54 = vld [vmem:[#allocation2 + $0x1a4] ss:$16 sps:$4 sm:$0xff]   ;;  %v4004_v56 = vld [vmem:[#allocation2 + $0x1a0] ss:$16 sps:$4 sm:$0xff]   ;;  %v4057_v27 = vld [vmem:[#allocation2 + $0xa8] ss:$16 sps:$4 sm:$0xff]  }
  0x8a   :  { %2257 = vmatprep.subr.bf16.mxu0 %v3966_v29  ;;  %v4002_v55 = vld [vmem:[#allocation2 + $0x3a4] ss:$16 sps:$4 sm:$0xff]   ;;  %v4005_v57 = vld [vmem:[#allocation2 + $0x3a0] ss:$16 sps:$4 sm:$0xff]   ;;  %v4065_v29 = vld [vmem:[#allocation2 + $0xcc] ss:$16 sps:$4 sm:$0xff]  }
  0x8b   :  { %v4006_v58 = vld [vmem:[#allocation2 + $0x1c4] ss:$16 sps:$4 sm:$0xff]   ;;  %v4010_v60 = vld [vmem:[#allocation2 + $0x1c0] ss:$16 sps:$4 sm:$0xff]  }
  0x8c   :  { %2215 = vmatpush1.bf16.msra.mxu1 %v3968_v30  ;;  %v4008_v59 = vld [vmem:[#allocation2 + $0x3c4] ss:$16 sps:$4 sm:$0xff]   ;;  %v4011_v61 = vld [vmem:[#allocation2 + $0x3c0] ss:$16 sps:$4 sm:$0xff]  }
  0x8d   :  { %2258 = vmatpush1.bf16.msra.mxu0 %v3969_v31  ;;  %2216 = vmatprep.subr.bf16.mxu1 %v3970_v32  ;;  %v4012_v62 = vld [vmem:[#allocation2 + $0x1e4] ss:$16 sps:$4 sm:$0xff]   ;;  %v4016_v0 = vld [vmem:[#allocation2 + $0x1e0] ss:$16 sps:$4 sm:$0xff]   ;;  %v4063_v31 = vld [vmem:[#allocation2 + $0xc8] ss:$16 sps:$4 sm:$0xff]  }
  0x8e   :  { %2259 = vmatprep.subr.bf16.mxu0 %v3972_v33  ;;  %v4014_v63 = vld [vmem:[#allocation2 + $0x3e4] ss:$16 sps:$4 sm:$0xff]   ;;  %v4017_v1 = vld [vmem:[#allocation2 + $0x3e0] ss:$16 sps:$4 sm:$0xff]   ;;  %v4071_v33 = vld [vmem:[#allocation2 + $0xec] ss:$16 sps:$4 sm:$0xff]  }
  0x8f   :  { %v4026_v2 = vld [vmem:[#allocation2 + $0x404] ss:$16 sps:$4 sm:$0xff]   ;;  %v4024_v6 = vld [vmem:[#allocation2 + $0x400] ss:$16 sps:$4 sm:$0xff]  }
  0x90   :  { %2217 = vmatpush1.bf16.msra.mxu1 %v3974_v34  ;;  %v4032_v8 = vld [vmem:[#allocation2 + $0x424] ss:$16 sps:$4 sm:$0xff]   ;;  %v4030_v10 = vld [vmem:[#allocation2 + $0x420] ss:$16 sps:$4 sm:$0xff]  }
  0x91   :  { %2260 = vmatpush1.bf16.msra.mxu0 %v3975_v35  ;;  %2218 = vmatprep.subr.bf16.mxu1 %v3976_v36  ;;  %v4038_v12 = vld [vmem:[#allocation2 + $0x444] ss:$16 sps:$4 sm:$0xff]   ;;  %v4036_v14 = vld [vmem:[#allocation2 + $0x440] ss:$16 sps:$4 sm:$0xff]   ;;  %v4069_v36 = vld [vmem:[#allocation2 + $0xe8] ss:$16 sps:$4 sm:$0xff]  }
  0x92   :  { %2261 = vmatprep.subr.bf16.mxu0 %v3978_v37  ;;  %v4044_v16 = vld [vmem:[#allocation2 + $0x464] ss:$16 sps:$4 sm:$0xff]   ;;  %v4042_v18 = vld [vmem:[#allocation2 + $0x460] ss:$16 sps:$4 sm:$0xff]  }
  0x93   :  { %v4050_v20 = vld [vmem:[#allocation2 + $0x484] ss:$16 sps:$4 sm:$0xff]   ;;  %v4048_v22 = vld [vmem:[#allocation2 + $0x480] ss:$16 sps:$4 sm:$0xff]  }
  0x94   :  { %2219 = vmatpush1.bf16.msra.mxu1 %v3980_v38  ;;  %v4056_v24 = vld [vmem:[#allocation2 + $0x4a4] ss:$16 sps:$4 sm:$0xff]   ;;  %v4054_v26 = vld [vmem:[#allocation2 + $0x4a0] ss:$16 sps:$4 sm:$0xff]   ;;  %v4077_v38 = vld [vmem:[#allocation2 + $0x10c] ss:$16 sps:$4 sm:$0xff]  }
  0x95   :  { %2262 = vmatpush1.bf16.msra.mxu0 %v3981_v39  ;;  %2220 = vmatprep.subr.bf16.mxu1 %v3982_v40  ;;  %v4062_v28 = vld [vmem:[#allocation2 + $0x4c4] ss:$16 sps:$4 sm:$0xff]   ;;  %v4060_v30 = vld [vmem:[#allocation2 + $0x4c0] ss:$16 sps:$4 sm:$0xff]   ;;  %v4075_v40 = vld [vmem:[#allocation2 + $0x108] ss:$16 sps:$4 sm:$0xff]  }
  0x96   :  { %2263 = vmatprep.subr.bf16.mxu0 %v3984_v41  ;;  %v4068_v32 = vld [vmem:[#allocation2 + $0x4e4] ss:$16 sps:$4 sm:$0xff]   ;;  %v4066_v35 = vld [vmem:[#allocation2 + $0x4e0] ss:$16 sps:$4 sm:$0xff]  }
  0x97   :  { %v4843_v34 = vld [vmem:[%s4945_s0 + $0x14] ss:$44 sps:$4 sm:$0xff]  }
  0x98   :  { %2221 = vmatpush1.bf16.msra.mxu1 %v3986_v42  ;;  %v4074_v37 = vld [vmem:[#allocation2 + $0x504] ss:$16 sps:$4 sm:$0xff]   ;;  %v4072_v39 = vld [vmem:[#allocation2 + $0x500] ss:$16 sps:$4 sm:$0xff]   ;;  %v4083_v42 = vld [vmem:[#allocation2 + $0x12c] ss:$16 sps:$4 sm:$0xff]  }
  0x99   :  { %2264 = vmatpush1.bf16.msra.mxu0 %v3987_v43  ;;  %2222 = vmatprep.subr.bf16.mxu1 %v3988_v44  ;;  %v4080_v41 = vld [vmem:[#allocation2 + $0x524] ss:$16 sps:$4 sm:$0xff]   ;;  %v4078_v43 = vld [vmem:[#allocation2 + $0x520] ss:$16 sps:$4 sm:$0xff]   ;;  %v4081_v44 = vld [vmem:[#allocation2 + $0x128] ss:$16 sps:$4 sm:$0xff]  }
  0x9a   :  { %2265 = vmatprep.subr.bf16.mxu0 %v3990_v45  ;;  %v4086_v45 = vld [vmem:[#allocation2 + $0x544] ss:$16 sps:$4 sm:$0xff]  }
  0x9c   :  { %2223 = vmatpush1.bf16.msra.mxu1 %v3992_v46  ;;  %v4089_v46 = vld [vmem:[#allocation2 + $0x14c] ss:$16 sps:$4 sm:$0xff]  }
  0x9d   :  { %2266 = vmatpush1.bf16.msra.mxu0 %v3993_v47  ;;  %2224 = vmatprep.subr.bf16.mxu1 %v3994_v48  ;;  %v4084_v47 = vld [vmem:[#allocation2 + $0x540] ss:$16 sps:$4 sm:$0xff]   ;;  %v4087_v48 = vld [vmem:[#allocation2 + $0x148] ss:$16 sps:$4 sm:$0xff]  }
  0x9e   :  { %2267 = vmatprep.subr.bf16.mxu0 %v3996_v50  ;;  %v4095_v50 = vld [vmem:[#allocation2 + $0x16c] ss:$16 sps:$4 sm:$0xff]  }
  0xa0   :  { %2225 = vmatpush1.bf16.msra.mxu1 %v3998_v52  ;;  %v4090_v52 = vld [vmem:[#allocation2 + $0x560] ss:$16 sps:$4 sm:$0xff]  }
  0xa1   :  { %2268 = vmatpush1.bf16.msra.mxu0 %v3999_v53  ;;  %2226 = vmatprep.subr.bf16.mxu1 %v4000_v54  ;;  %v4093_v53 = vld [vmem:[#allocation2 + $0x168] ss:$16 sps:$4 sm:$0xff]   ;;  %v4098_v54 = vld [vmem:[#allocation2 + $0x584] ss:$16 sps:$4 sm:$0xff]  }
  0xa2   :  { %2269 = vmatprep.subr.bf16.mxu0 %v4002_v55  ;;  %v4101_v55 = vld [vmem:[#allocation2 + $0x18c] ss:$16 sps:$4 sm:$0xff]  }
  0xa4   :  { %2227 = vmatpush1.bf16.msra.mxu1 %v4004_v56  ;;  %v4096_v56 = vld [vmem:[#allocation2 + $0x580] ss:$16 sps:$4 sm:$0xff]  }
  0xa5   :  { %2270 = vmatpush1.bf16.msra.mxu0 %v4005_v57  ;;  %2228 = vmatprep.subr.bf16.mxu1 %v4006_v58  ;;  %v4099_v57 = vld [vmem:[#allocation2 + $0x188] ss:$16 sps:$4 sm:$0xff]   ;;  %v4104_v58 = vld [vmem:[#allocation2 + $0x5a4] ss:$16 sps:$4 sm:$0xff]  }
  0xa6   :  { %2271 = vmatprep.subr.bf16.mxu0 %v4008_v59  ;;  %v4107_v59 = vld [vmem:[#allocation2 + $0x1ac] ss:$16 sps:$4 sm:$0xff]  }
  0xa8   :  { %2229 = vmatpush1.bf16.msra.mxu1 %v4010_v60  ;;  %v4102_v60 = vld [vmem:[#allocation2 + $0x5a0] ss:$16 sps:$4 sm:$0xff]  }
  0xa9   :  { %2272 = vmatpush1.bf16.msra.mxu0 %v4011_v61  ;;  %2230 = vmatprep.subr.bf16.mxu1 %v4012_v62  ;;  %v4105_v61 = vld [vmem:[#allocation2 + $0x1a8] ss:$16 sps:$4 sm:$0xff]   ;;  %v4110_v62 = vld [vmem:[#allocation2 + $0x5c4] ss:$16 sps:$4 sm:$0xff]  }
  0xaa   :  { %2273 = vmatprep.subr.bf16.mxu0 %v4014_v63  ;;  %v4113_v63 = vld [vmem:[#allocation2 + $0x1cc] ss:$16 sps:$4 sm:$0xff]  }
  0xac   :  { %2231 = vmatpush1.bf16.msra.mxu1 %v4016_v0  ;;  %v4108_v0 = vld [vmem:[#allocation2 + $0x5c0] ss:$16 sps:$4 sm:$0xff]  }
  0xad   :  { %2274 = vmatpush1.bf16.msra.mxu0 %v4017_v1  ;;  %2458 = vmatprep.subr.bf16.mxu1 %v4029_v3  ;;  %v4111_v1 = vld [vmem:[#allocation2 + $0x1c8] ss:$16 sps:$4 sm:$0xff]   ;;  %v4119_v3 = vld [vmem:[#allocation2 + $0x1ec] ss:$16 sps:$4 sm:$0xff]  }
  0xae   :  { %2286 = vmatprep.subr.bf16.mxu0 %v4026_v2  ;;  %v4116_v2 = vld [vmem:[#allocation2 + $0x5e4] ss:$16 sps:$4 sm:$0xff]  }
  0xaf   :  { %2233 = vmatmul.mubr.bf16.vlgmr.msra.gmra.mrb[0].mxu1 %v4831_v4 }
  0xb0   :  { %2276 = vmatmul.mubr.bf16.vlgmr.msra.gmra.mrb[0].mxu0 %v4836_v5  ;;  %2459 = vmatpush1.bf16.msra.mxu1 %v4027_v7  ;;  %v4117_v7 = vld [vmem:[#allocation2 + $0x1e8] ss:$16 sps:$4 sm:$0xff]  }
  0xb1   :  { %2287 = vmatpush1.bf16.msra.mxu0 %v4024_v6  ;;  %2460 = vmatprep.subr.bf16.mxu1 %v4035_v9  ;;  %v4114_v6 = vld [vmem:[#allocation2 + $0x5e0] ss:$16 sps:$4 sm:$0xff]   ;;  %v4128_v9 = vld [vmem:[#allocation2 + $0x20c] ss:$16 sps:$4 sm:$0xff]  }
  0xb2   :  { %2288 = vmatprep.subr.bf16.mxu0 %v4032_v8  ;;  %2490 = vmatprep.mubr.bf16.mxu1 %v4020_v49  ;;  %v4092_v49 = vld [vmem:[#allocation2 + $0x564] ss:$16 sps:$4 sm:$0xff]  }
  0xb3   :  { %2318 = vmatprep.mubr.bf16.mxu0 %v4843_v34  ;;  %v4125_v8 = vld [vmem:[#allocation2 + $0x604] ss:$16 sps:$4 sm:$0xff]  }
  0xb4   :  { %2461 = vmatpush1.bf16.msra.mxu1 %v4033_v11  ;;  %v4123_v11 = vld [vmem:[#allocation2 + $0x600] ss:$16 sps:$4 sm:$0xff]  }
  0xb5   :  { %2289 = vmatpush1.bf16.msra.mxu0 %v4030_v10  ;;  %2462 = vmatprep.subr.bf16.mxu1 %v4041_v13  ;;  %v4120_v10 = vld [vmem:[%s4945_s0 + $0x10] ss:$44 sps:$4 sm:$0xff]   ;;  %v4131_v13 = vld [vmem:[#allocation2 + $0x624] ss:$16 sps:$4 sm:$0xff]  }
  0xb6   :  { %2290 = vmatprep.subr.bf16.mxu0 %v4038_v12  ;;  %v4126_v12 = vld [vmem:[#allocation2 + $0x208] ss:$16 sps:$4 sm:$0xff]  }
  0xb8   :  { %2463 = vmatpush1.bf16.msra.mxu1 %v4039_v15  ;;  %v4129_v15 = vld [vmem:[#allocation2 + $0x620] ss:$16 sps:$4 sm:$0xff]  }
  0xb9   :  { %2291 = vmatpush1.bf16.msra.mxu0 %v4036_v14  ;;  %2464 = vmatprep.subr.bf16.mxu1 %v4047_v17  ;;  %v4134_v14 = vld [vmem:[#allocation2 + $0x22c] ss:$16 sps:$4 sm:$0xff]   ;;  %v4137_v17 = vld [vmem:[#allocation2 + $0x644] ss:$16 sps:$4 sm:$0xff]  }
  0xba   :  { %2292 = vmatprep.subr.bf16.mxu0 %v4044_v16  ;;  %v4132_v16 = vld [vmem:[#allocation2 + $0x228] ss:$16 sps:$4 sm:$0xff]  }
  0xbc   :  { %2465 = vmatpush1.bf16.msra.mxu1 %v4045_v19  ;;  %v4853_v19 = vld [vmem:[%s4945_s0 + $0x1c] ss:$44 sps:$4 sm:$0xff]  }
  0xbd   :  { %2293 = vmatpush1.bf16.msra.mxu0 %v4042_v18  ;;  %2466 = vmatprep.subr.bf16.mxu1 %v4053_v21  ;;  %v4140_v18 = vld [vmem:[#allocation2 + $0x24c] ss:$16 sps:$4 sm:$0xff]   ;;  %v4138_v21 = vld [vmem:[#allocation2 + $0x248] ss:$16 sps:$4 sm:$0xff]  }
  0xbe   :  { %2294 = vmatprep.subr.bf16.mxu0 %v4050_v20  ;;  %v4135_v20 = vld [vmem:[#allocation2 + $0x640] ss:$16 sps:$4 sm:$0xff]  }
  0xc0   :  { %2467 = vmatpush1.bf16.msra.mxu1 %v4051_v23  ;;  %v4141_v23 = vld [vmem:[#allocation2 + $0x660] ss:$16 sps:$4 sm:$0xff]  }
  0xc1   :  { %2295 = vmatpush1.bf16.msra.mxu0 %v4048_v22  ;;  %2468 = vmatprep.subr.bf16.mxu1 %v4059_v25  ;;  %v4146_v22 = vld [vmem:[#allocation2 + $0x26c] ss:$16 sps:$4 sm:$0xff]   ;;  %v4149_v25 = vld [vmem:[#allocation2 + $0x684] ss:$16 sps:$4 sm:$0xff]  }
  0xc2   :  { %2296 = vmatprep.subr.bf16.mxu0 %v4056_v24  ;;  %v4144_v24 = vld [vmem:[#allocation2 + $0x268] ss:$16 sps:$4 sm:$0xff]  }
  0xc4   :  { %2469 = vmatpush1.bf16.msra.mxu1 %v4057_v27  ;;  %v4147_v27 = vld [vmem:[#allocation2 + $0x680] ss:$16 sps:$4 sm:$0xff]  }
  0xc5   :  { %2297 = vmatpush1.bf16.msra.mxu0 %v4054_v26  ;;  %2470 = vmatprep.subr.bf16.mxu1 %v4065_v29  ;;  %v4152_v26 = vld [vmem:[#allocation2 + $0x28c] ss:$16 sps:$4 sm:$0xff]  }
  0xc6   :  { %2298 = vmatprep.subr.bf16.mxu0 %v4062_v28  ;;  %v4155_v28 = vld [vmem:[#allocation2 + $0x6a4] ss:$16 sps:$4 sm:$0xff]   ;;  %v4158_v29 = vld [vmem:[#allocation2 + $0x2ac] ss:$16 sps:$4 sm:$0xff]  }
  0xc8   :  { %2471 = vmatpush1.bf16.msra.mxu1 %v4063_v31  ;;  %v4156_v31 = vld [vmem:[#allocation2 + $0x2a8] ss:$16 sps:$4 sm:$0xff]  }
  0xc9   :  { %2299 = vmatpush1.bf16.msra.mxu0 %v4060_v30  ;;  %2472 = vmatprep.subr.bf16.mxu1 %v4071_v33  ;;  %v4153_v30 = vld [vmem:[#allocation2 + $0x6a0] ss:$16 sps:$4 sm:$0xff]   ;;  %v4164_v33 = vld [vmem:[#allocation2 + $0x2cc] ss:$16 sps:$4 sm:$0xff]  }
  0xca   :  { %2300 = vmatprep.subr.bf16.mxu0 %v4068_v32  ;;  %v4161_v32 = vld [vmem:[#allocation2 + $0x6c4] ss:$16 sps:$4 sm:$0xff]  }
  0xcc   :  { %2473 = vmatpush1.bf16.msra.mxu1 %v4069_v36  ;;  %v4162_v36 = vld [vmem:[#allocation2 + $0x2c8] ss:$16 sps:$4 sm:$0xff]  }
  0xcd   :  { %2301 = vmatpush1.bf16.msra.mxu0 %v4066_v35  ;;  %2474 = vmatprep.subr.bf16.mxu1 %v4077_v38  ;;  %v4159_v35 = vld [vmem:[#allocation2 + $0x6c0] ss:$16 sps:$4 sm:$0xff]   ;;  %v4170_v38 = vld [vmem:[#allocation2 + $0x2ec] ss:$16 sps:$4 sm:$0xff]  }
  0xce   :  { %2302 = vmatprep.subr.bf16.mxu0 %v4074_v37  ;;  %v4167_v37 = vld [vmem:[#allocation2 + $0x6e4] ss:$16 sps:$4 sm:$0xff]  }
  0xd0   :  { %2475 = vmatpush1.bf16.msra.mxu1 %v4075_v40  ;;  %v4168_v40 = vld [vmem:[#allocation2 + $0x2e8] ss:$16 sps:$4 sm:$0xff]  }
  0xd1   :  { %2303 = vmatpush1.bf16.msra.mxu0 %v4072_v39  ;;  %2476 = vmatprep.subr.bf16.mxu1 %v4083_v42  ;;  %v4165_v39 = vld [vmem:[#allocation2 + $0x6e0] ss:$16 sps:$4 sm:$0xff]   ;;  %v4176_v42 = vld [vmem:[#allocation2 + $0x30c] ss:$16 sps:$4 sm:$0xff]  }
  0xd2   :  { %2304 = vmatprep.subr.bf16.mxu0 %v4080_v41  ;;  %v4173_v41 = vld [vmem:[#allocation2 + $0x704] ss:$16 sps:$4 sm:$0xff]  }
  0xd4   :  { %2477 = vmatpush1.bf16.msra.mxu1 %v4081_v44  ;;  %v4174_v44 = vld [vmem:[#allocation2 + $0x308] ss:$16 sps:$4 sm:$0xff]  }
  0xd5   :  { %2305 = vmatpush1.bf16.msra.mxu0 %v4078_v43  ;;  %2478 = vmatprep.subr.bf16.mxu1 %v4089_v46  ;;  %v4171_v43 = vld [vmem:[#allocation2 + $0x700] ss:$16 sps:$4 sm:$0xff]   ;;  %v4182_v46 = vld [vmem:[#allocation2 + $0x32c] ss:$16 sps:$4 sm:$0xff]  }
  0xd6   :  { %2306 = vmatprep.subr.bf16.mxu0 %v4086_v45  ;;  %v4179_v45 = vld [vmem:[#allocation2 + $0x724] ss:$16 sps:$4 sm:$0xff]  }
  0xd8   :  { %2479 = vmatpush1.bf16.msra.mxu1 %v4087_v48  ;;  %v4180_v48 = vld [vmem:[#allocation2 + $0x328] ss:$16 sps:$4 sm:$0xff]  }
  0xd9   :  { %2307 = vmatpush1.bf16.msra.mxu0 %v4084_v47  ;;  %2480 = vmatprep.subr.bf16.mxu1 %v4095_v50  ;;  %v4177_v47 = vld [vmem:[#allocation2 + $0x720] ss:$16 sps:$4 sm:$0xff]   ;;  %v4188_v50 = vld [vmem:[#allocation2 + $0x34c] ss:$16 sps:$4 sm:$0xff]  }
  0xda   :  { %2308 = vmatprep.subr.bf16.mxu0 %v4092_v49  ;;  %v4185_v49 = vld [vmem:[#allocation2 + $0x744] ss:$16 sps:$4 sm:$0xff]  }
  0xdc   :  { %2481 = vmatpush1.bf16.msra.mxu1 %v4093_v53  ;;  %v4186_v53 = vld [vmem:[#allocation2 + $0x348] ss:$16 sps:$4 sm:$0xff]  }
  0xdd   :  { %2309 = vmatpush1.bf16.msra.mxu0 %v4090_v52  ;;  %2482 = vmatprep.subr.bf16.mxu1 %v4101_v55  ;;  %v4183_v52 = vld [vmem:[#allocation2 + $0x740] ss:$16 sps:$4 sm:$0xff]   ;;  %v4194_v55 = vld [vmem:[#allocation2 + $0x36c] ss:$16 sps:$4 sm:$0xff]  }
  0xde   :  { %2310 = vmatprep.subr.bf16.mxu0 %v4098_v54  ;;  %v4191_v54 = vld [vmem:[#allocation2 + $0x764] ss:$16 sps:$4 sm:$0xff]  }
  0xe0   :  { %2483 = vmatpush1.bf16.msra.mxu1 %v4099_v57  ;;  %v4192_v57 = vld [vmem:[#allocation2 + $0x368] ss:$16 sps:$4 sm:$0xff]  }
  0xe1   :  { %2311 = vmatpush1.bf16.msra.mxu0 %v4096_v56  ;;  %2484 = vmatprep.subr.bf16.mxu1 %v4107_v59  ;;  %v4189_v56 = vld [vmem:[#allocation2 + $0x760] ss:$16 sps:$4 sm:$0xff]   ;;  %v4200_v59 = vld [vmem:[#allocation2 + $0x38c] ss:$16 sps:$4 sm:$0xff]  }
  0xe2   :  { %2312 = vmatprep.subr.bf16.mxu0 %v4104_v58  ;;  %v4197_v58 = vld [vmem:[#allocation2 + $0x784] ss:$16 sps:$4 sm:$0xff]  }
  0xe4   :  { %2485 = vmatpush1.bf16.msra.mxu1 %v4105_v61  ;;  %v4198_v61 = vld [vmem:[#allocation2 + $0x388] ss:$16 sps:$4 sm:$0xff]  }
  0xe5   :  { %2313 = vmatpush1.bf16.msra.mxu0 %v4102_v60  ;;  %2486 = vmatprep.subr.bf16.mxu1 %v4113_v63  ;;  %v4195_v60 = vld [vmem:[#allocation2 + $0x780] ss:$16 sps:$4 sm:$0xff]   ;;  %v4206_v63 = vld [vmem:[#allocation2 + $0x3ac] ss:$16 sps:$4 sm:$0xff]  }
  0xe6   :  { %2314 = vmatprep.subr.bf16.mxu0 %v4110_v62  ;;  %v4203_v62 = vld [vmem:[#allocation2 + $0x7a4] ss:$16 sps:$4 sm:$0xff]  }
  0xe8   :  { %2487 = vmatpush1.bf16.msra.mxu1 %v4111_v1  ;;  %v4204_v1 = vld [vmem:[#allocation2 + $0x3a8] ss:$16 sps:$4 sm:$0xff]  }
  0xe9   :  { %2315 = vmatpush1.bf16.msra.mxu0 %v4108_v0  ;;  %2488 = vmatprep.subr.bf16.mxu1 %v4119_v3  ;;  %v4201_v0 = vld [vmem:[#allocation2 + $0x7a0] ss:$16 sps:$4 sm:$0xff]   ;;  %v4212_v3 = vld [vmem:[#allocation2 + $0x3cc] ss:$16 sps:$4 sm:$0xff]  }
  0xea   :  { %2316 = vmatprep.subr.bf16.mxu0 %v4116_v2  ;;  %v4209_v2 = vld [vmem:[#allocation2 + $0x7c4] ss:$16 sps:$4 sm:$0xff]  }
  0xec   :  { %2489 = vmatpush1.bf16.msra.mxu1 %v4117_v7  ;;  %v4210_v7 = vld [vmem:[#allocation2 + $0x3c8] ss:$16 sps:$4 sm:$0xff]  }
  0xed   :  { %2317 = vmatpush1.bf16.msra.mxu0 %v4114_v6  ;;  %2501 = vmatprep.subr.bf16.mxu1 %v4128_v9  ;;  %v4207_v6 = vld [vmem:[#allocation2 + $0x7c0] ss:$16 sps:$4 sm:$0xff]   ;;  %v4218_v9 = vld [vmem:[#allocation2 + $0x3ec] ss:$16 sps:$4 sm:$0xff]  }
  0xee   :  { %2329 = vmatprep.subr.bf16.mxu0 %v4125_v8  ;;  %v4215_v8 = vld [vmem:[#allocation2 + $0x7e4] ss:$16 sps:$4 sm:$0xff]  }
  0xef   :  { %2491 = vmatmul.mubr.bf16.vlgmr.msra.gmra.mrb[4].mxu1 %v4831_v4  ;;  %v4143_v4 = vld [vmem:[#allocation2 + $0x664] ss:$16 sps:$4 sm:$0xff]  }
  0xf0   :  { %2319 = vmatmul.mubr.bf16.vlgmr.msra.gmra.mrb[0].mxu0 %v4120_v10  ;;  %2502 = vmatpush1.bf16.msra.mxu1 %v4126_v12  ;;  %v4213_v10 = vld [vmem:[#allocation2 + $0x7e0] ss:$16 sps:$4 sm:$0xff]   ;;  %v4224_v12 = vld [vmem:[#allocation2 + $0x804] ss:$16 sps:$4 sm:$0xff]  }
  0xf1   :  { %2330 = vmatpush1.bf16.msra.mxu0 %v4123_v11  ;;  %2503 = vmatprep.subr.bf16.mxu1 %v4134_v14  ;;  %v4216_v11 = vld [vmem:[#allocation2 + $0x3e8] ss:$16 sps:$4 sm:$0xff]  }
  0xf2   :  { %2331 = vmatprep.subr.bf16.mxu0 %v4131_v13  ;;  %2533 = vmatprep.mubr.bf16.mxu1 %v4825_v51  ;;  %v4150_v51 = vld [vmem:[#allocation2 + $0x288] ss:$16 sps:$4 sm:$0xff]   ;;  %v4227_v13 = vld [vmem:[#allocation2 + $0x40c] ss:$16 sps:$4 sm:$0xff]  }
  0xf3   :  { %2361 = vmatprep.mubr.bf16.mxu0 %v4853_v19  ;;  %v4860_v14 = vld [vmem:[%s4945_s0 + $0x18] ss:$44 sps:$4 sm:$0xff]  }
  0xf4   :  { %2504 = vmatpush1.bf16.msra.mxu1 %v4132_v16  ;;  %v4225_v16 = vld [vmem:[#allocation2 + $0x408] ss:$16 sps:$4 sm:$0xff]  }
  0xf5   :  { %2332 = vmatpush1.bf16.msra.mxu0 %v4129_v15  ;;  %2505 = vmatprep.subr.bf16.mxu1 %v4140_v18  ;;  %v4222_v15 = vld [vmem:[#allocation2 + $0x800] ss:$16 sps:$4 sm:$0xff]   ;;  %v4233_v18 = vld [vmem:[#allocation2 + $0x42c] ss:$16 sps:$4 sm:$0xff]  }
  0xf6   :  { %2333 = vmatprep.subr.bf16.mxu0 %v4137_v17  ;;  %v4230_v17 = vld [vmem:[#allocation2 + $0x824] ss:$16 sps:$4 sm:$0xff]  }
  0xf8   :  { %2506 = vmatpush1.bf16.msra.mxu1 %v4138_v21  ;;  %v4228_v21 = vld [vmem:[#allocation2 + $0x820] ss:$16 sps:$4 sm:$0xff]  }
  0xf9   :  { %2334 = vmatpush1.bf16.msra.mxu0 %v4135_v20  ;;  %2507 = vmatprep.subr.bf16.mxu1 %v4146_v22  ;;  %v4865_v20 = vld [vmem:[%s4945_s0 + $0x24] ss:$44 sps:$4 sm:$0xff]  }
  0xfa   :  { %2335 = vmatprep.subr.bf16.mxu0 %v4143_v4  ;;  %v4231_v4 = vld [vmem:[#allocation2 + $0x428] ss:$16 sps:$4 sm:$0xff]   ;;  %v4236_v22 = vld [vmem:[#allocation2 + $0x844] ss:$16 sps:$4 sm:$0xff]  }
  0xfc   :  { %2508 = vmatpush1.bf16.msra.mxu1 %v4144_v24  ;;  %v4234_v24 = vld [vmem:[#allocation2 + $0x840] ss:$16 sps:$4 sm:$0xff]  }
  0xfd   :  { %2336 = vmatpush1.bf16.msra.mxu0 %v4141_v23  ;;  %2509 = vmatprep.subr.bf16.mxu1 %v4152_v26  ;;  %v4239_v23 = vld [vmem:[#allocation2 + $0x44c] ss:$16 sps:$4 sm:$0xff]   ;;  %v4242_v26 = vld [vmem:[#allocation2 + $0x864] ss:$16 sps:$4 sm:$0xff]  }
  0xfe   :  { %2337 = vmatprep.subr.bf16.mxu0 %v4149_v25  ;;  %v4237_v25 = vld [vmem:[#allocation2 + $0x448] ss:$16 sps:$4 sm:$0xff]  }
 0x100   :  { %2510 = vmatpush1.bf16.msra.mxu1 %v4150_v51  ;;  %v4243_v51 = vld [vmem:[#allocation2 + $0x468] ss:$16 sps:$4 sm:$0xff]  }
 0x101   :  { %2338 = vmatpush1.bf16.msra.mxu0 %v4147_v27  ;;  %2511 = vmatprep.subr.bf16.mxu1 %v4158_v29  ;;  %v4240_v27 = vld [vmem:[#allocation2 + $0x860] ss:$16 sps:$4 sm:$0xff]   ;;  %v4251_v29 = vld [vmem:[#allocation2 + $0x48c] ss:$16 sps:$4 sm:$0xff]  }
 0x102   :  { %2339 = vmatprep.subr.bf16.mxu0 %v4155_v28  ;;  %v4248_v28 = vld [vmem:[#allocation2 + $0x884] ss:$16 sps:$4 sm:$0xff]  }
 0x104   :  { %2512 = vmatpush1.bf16.msra.mxu1 %v4156_v31  ;;  %v4249_v31 = vld [vmem:[#allocation2 + $0x488] ss:$16 sps:$4 sm:$0xff]  }
 0x105   :  { %2340 = vmatpush1.bf16.msra.mxu0 %v4153_v30  ;;  %2513 = vmatprep.subr.bf16.mxu1 %v4164_v33  ;;  %v4246_v30 = vld [vmem:[#allocation2 + $0x880] ss:$16 sps:$4 sm:$0xff]  }
 0x106   :  { %2341 = vmatprep.subr.bf16.mxu0 %v4161_v32  ;;  %v4257_v32 = vld [vmem:[#allocation2 + $0x4ac] ss:$16 sps:$4 sm:$0xff]   ;;  %v4252_v33 = vld [vmem:[#allocation2 + $0x8a0] ss:$16 sps:$4 sm:$0xff]  }
 0x108   :  { %2514 = vmatpush1.bf16.msra.mxu1 %v4162_v36  ;;  %v4260_v36 = vld [vmem:[#allocation2 + $0x8c4] ss:$16 sps:$4 sm:$0xff]  }
 0x109   :  { %2342 = vmatpush1.bf16.msra.mxu0 %v4159_v35  ;;  %2515 = vmatprep.subr.bf16.mxu1 %v4170_v38  ;;  %v4255_v35 = vld [vmem:[#allocation2 + $0x4a8] ss:$16 sps:$4 sm:$0xff]   ;;  %v4258_v38 = vld [vmem:[#allocation2 + $0x8c0] ss:$16 sps:$4 sm:$0xff]  }
 0x10a   :  { %2343 = vmatprep.subr.bf16.mxu0 %v4167_v37  ;;  %v4263_v37 = vld [vmem:[#allocation2 + $0x4cc] ss:$16 sps:$4 sm:$0xff]  }
 0x10c   :  { %2516 = vmatpush1.bf16.msra.mxu1 %v4168_v40  ;;  %v4266_v40 = vld [vmem:[#allocation2 + $0x8e4] ss:$16 sps:$4 sm:$0xff]  }
 0x10d   :  { %2344 = vmatpush1.bf16.msra.mxu0 %v4165_v39  ;;  %2517 = vmatprep.subr.bf16.mxu1 %v4176_v42  ;;  %v4261_v39 = vld [vmem:[#allocation2 + $0x4c8] ss:$16 sps:$4 sm:$0xff]   ;;  %v4264_v42 = vld [vmem:[#allocation2 + $0x8e0] ss:$16 sps:$4 sm:$0xff]  }
 0x10e   :  { %2345 = vmatprep.subr.bf16.mxu0 %v4173_v41  ;;  %v4269_v41 = vld [vmem:[#allocation2 + $0x4ec] ss:$16 sps:$4 sm:$0xff]  }
 0x110   :  { %2518 = vmatpush1.bf16.msra.mxu1 %v4174_v44  ;;  %v4272_v44 = vld [vmem:[#allocation2 + $0x904] ss:$16 sps:$4 sm:$0xff]  }
 0x111   :  { %2346 = vmatpush1.bf16.msra.mxu0 %v4171_v43  ;;  %2519 = vmatprep.subr.bf16.mxu1 %v4182_v46  ;;  %v4267_v43 = vld [vmem:[#allocation2 + $0x4e8] ss:$16 sps:$4 sm:$0xff]   ;;  %v4270_v46 = vld [vmem:[#allocation2 + $0x900] ss:$16 sps:$4 sm:$0xff]  }
 0x112   :  { %2347 = vmatprep.subr.bf16.mxu0 %v4179_v45  ;;  %v4275_v45 = vld [vmem:[#allocation2 + $0x50c] ss:$16 sps:$4 sm:$0xff]  }
 0x114   :  { %2520 = vmatpush1.bf16.msra.mxu1 %v4180_v48  ;;  %v4278_v48 = vld [vmem:[#allocation2 + $0x924] ss:$16 sps:$4 sm:$0xff]  }
 0x115   :  { %2348 = vmatpush1.bf16.msra.mxu0 %v4177_v47  ;;  %2521 = vmatprep.subr.bf16.mxu1 %v4188_v50  ;;  %v4273_v47 = vld [vmem:[#allocation2 + $0x508] ss:$16 sps:$4 sm:$0xff]   ;;  %v4276_v50 = vld [vmem:[#allocation2 + $0x920] ss:$16 sps:$4 sm:$0xff]  }
 0x116   :  { %2349 = vmatprep.subr.bf16.mxu0 %v4185_v49  ;;  %v4281_v49 = vld [vmem:[#allocation2 + $0x52c] ss:$16 sps:$4 sm:$0xff]  }
 0x118   :  { %2522 = vmatpush1.bf16.msra.mxu1 %v4186_v53  ;;  %v4284_v53 = vld [vmem:[#allocation2 + $0x944] ss:$16 sps:$4 sm:$0xff]  }
 0x119   :  { %2350 = vmatpush1.bf16.msra.mxu0 %v4183_v52  ;;  %2523 = vmatprep.subr.bf16.mxu1 %v4194_v55  ;;  %v4279_v52 = vld [vmem:[#allocation2 + $0x528] ss:$16 sps:$4 sm:$0xff]   ;;  %v4282_v55 = vld [vmem:[#allocation2 + $0x940] ss:$16 sps:$4 sm:$0xff]  }
 0x11a   :  { %2351 = vmatprep.subr.bf16.mxu0 %v4191_v54  ;;  %v4287_v54 = vld [vmem:[#allocation2 + $0x54c] ss:$16 sps:$4 sm:$0xff]  }
 0x11c   :  { %2524 = vmatpush1.bf16.msra.mxu1 %v4192_v57  ;;  %v4290_v57 = vld [vmem:[#allocation2 + $0x964] ss:$16 sps:$4 sm:$0xff]  }
 0x11d   :  { %2352 = vmatpush1.bf16.msra.mxu0 %v4189_v56  ;;  %2525 = vmatprep.subr.bf16.mxu1 %v4200_v59  ;;  %v4285_v56 = vld [vmem:[#allocation2 + $0x548] ss:$16 sps:$4 sm:$0xff]   ;;  %v4288_v59 = vld [vmem:[#allocation2 + $0x960] ss:$16 sps:$4 sm:$0xff]  }
 0x11e   :  { %2353 = vmatprep.subr.bf16.mxu0 %v4197_v58  ;;  %v4293_v58 = vld [vmem:[#allocation2 + $0x56c] ss:$16 sps:$4 sm:$0xff]  }
 0x120   :  { %2526 = vmatpush1.bf16.msra.mxu1 %v4198_v61  ;;  %v4296_v61 = vld [vmem:[#allocation2 + $0x984] ss:$16 sps:$4 sm:$0xff]  }
 0x121   :  { %2354 = vmatpush1.bf16.msra.mxu0 %v4195_v60  ;;  %2527 = vmatprep.subr.bf16.mxu1 %v4206_v63  ;;  %v4291_v60 = vld [vmem:[#allocation2 + $0x568] ss:$16 sps:$4 sm:$0xff]   ;;  %v4294_v63 = vld [vmem:[#allocation2 + $0x980] ss:$16 sps:$4 sm:$0xff]  }
 0x122   :  { %2355 = vmatprep.subr.bf16.mxu0 %v4203_v62  ;;  %v4299_v62 = vld [vmem:[#allocation2 + $0x58c] ss:$16 sps:$4 sm:$0xff]  }
 0x124   :  { %2528 = vmatpush1.bf16.msra.mxu1 %v4204_v1  ;;  %v4302_v1 = vld [vmem:[#allocation2 + $0x9a4] ss:$16 sps:$4 sm:$0xff]  }
 0x125   :  { %2356 = vmatpush1.bf16.msra.mxu0 %v4201_v0  ;;  %2529 = vmatprep.subr.bf16.mxu1 %v4212_v3  ;;  %v4297_v0 = vld [vmem:[#allocation2 + $0x588] ss:$16 sps:$4 sm:$0xff]   ;;  %v4300_v3 = vld [vmem:[#allocation2 + $0x9a0] ss:$16 sps:$4 sm:$0xff]  }
 0x126   :  { %2357 = vmatprep.subr.bf16.mxu0 %v4209_v2  ;;  %v4305_v2 = vld [vmem:[#allocation2 + $0x5ac] ss:$16 sps:$4 sm:$0xff]  }
 0x128   :  { %2530 = vmatpush1.bf16.msra.mxu1 %v4210_v7  ;;  %v4308_v7 = vld [vmem:[#allocation2 + $0x9c4] ss:$16 sps:$4 sm:$0xff]  }
 0x129   :  { %2358 = vmatpush1.bf16.msra.mxu0 %v4207_v6  ;;  %2531 = vmatprep.subr.bf16.mxu1 %v4218_v9  ;;  %v4303_v6 = vld [vmem:[#allocation2 + $0x5a8] ss:$16 sps:$4 sm:$0xff]   ;;  %v4705_v9 = vmov 65535  }
 0x12a   :  { %2359 = vmatprep.subr.bf16.mxu0 %v4215_v8  ;;  %v4311_v8 = vld [vmem:[#allocation2 + $0x5cc] ss:$16 sps:$4 sm:$0xff]  }
 0x12c   :  { %2532 = vmatpush1.bf16.msra.mxu1 %v4216_v11  ;;  %v4306_v11 = vld [vmem:[#allocation2 + $0x9c0] ss:$16 sps:$4 sm:$0xff]  }
 0x12d   :  { %2360 = vmatpush1.bf16.msra.mxu0 %v4213_v10  ;;  %2544 = vmatprep.subr.bf16.mxu1 %v4227_v13  ;;  %v2186_v10 = vsel %vm2184_vm0, 4294967295, %v4705_v9  ;;  %v4314_v13 = vld [vmem:[#allocation2 + $0x9e4] ss:$16 sps:$4 sm:$0xff]   ;;  %v4450_v9 = vld [vmem:[#allocation6 + $0x44] ss:$8 sps:$4 sm:$0xff]  }
 0x12e   :  { %2372 = vmatprep.subr.bf16.mxu0 %v4224_v12  ;;  %v4309_v12 = vld [vmem:[#allocation2 + $0x5c8] ss:$16 sps:$4 sm:$0xff]  }
 0x12f   :  { %2534 = vmatmul.mubr.bf16.vlgmr.msra.gmra.mrb[4].mxu1 %v4836_v5  ;;  %v4245_v5 = vld [vmem:[#allocation2 + $0x46c] ss:$16 sps:$4 sm:$0xff]  }
 0x130   :  { %2362 = vmatmul.mubr.bf16.vlgmr.msra.gmra.mrb[0].mxu0 %v4860_v14  ;;  %2545 = vmatpush1.bf16.msra.mxu1 %v4225_v16  ;;  %v4871_v16 = vsel %vm2185_vm1, %v2186_v10, 0  ;;  %v4361_v10 = vld [vmem:[#allocation2 + $0x748] ss:$16 sps:$4 sm:$0xff]  }
 0x131   :  { %2373 = vmatpush1.bf16.msra.mxu0 %v4222_v15  ;;  %2546 = vmatprep.subr.bf16.mxu1 %v4233_v18  ;;  %v4317_v15 = vld [vmem:[#allocation2 + $0x5ec] ss:$16 sps:$4 sm:$0xff]   ;;  %v4315_v18 = vld [vmem:[#allocation2 + $0x5e8] ss:$16 sps:$4 sm:$0xff]  }
 0x132   :  { %2374 = vmatprep.subr.bf16.mxu0 %v4230_v17  ;;  %2404 = vmatprep.mubr.bf16.mxu0 %v4865_v20  ;;  %v4312_v17 = vld [vmem:[#allocation2 + $0x9e0] ss:$16 sps:$4 sm:$0xff]  }
 0x133   :  { %2576 = vmatprep.mubr.bf16.mxu1 %v4843_v34  ;;  %v4254_v34 = vld [vmem:[#allocation2 + $0x8a4] ss:$16 sps:$4 sm:$0xff]  }
 0x134   :  { %2547 = vmatpush1.bf16.msra.mxu1 %v4231_v4  ;;  %v4326_v4 = vld [vmem:[#allocation2 + $0x60c] ss:$16 sps:$4 sm:$0xff]  }
 0x135   :  { %2375 = vmatpush1.bf16.msra.mxu0 %v4228_v21  ;;  %2548 = vmatprep.subr.bf16.mxu1 %v4239_v23  ;;  %v4323_v21 = vld [vmem:[#allocation2 + $0xa04] ss:$16 sps:$4 sm:$0xff]   ;;  %v4321_v23 = vld [vmem:[#allocation2 + $0xa00] ss:$16 sps:$4 sm:$0xff]  }
 0x136   :  { %2376 = vmatprep.subr.bf16.mxu0 %v4236_v22  ;;  %v4876_v22 = vld [vmem:[%s4945_s0 + $0x20] ss:$44 sps:$4 sm:$0xff]  }
 0x138   :  { %2549 = vmatpush1.bf16.msra.mxu1 %v4237_v25  ;;  %v4329_v25 = vld [vmem:[#allocation2 + $0xa24] ss:$16 sps:$4 sm:$0xff]  }
 0x139   :  { %2377 = vmatpush1.bf16.msra.mxu0 %v4234_v24  ;;  %2550 = vmatprep.subr.bf16.mxu1 %v4245_v5  ;;  %v4324_v24 = vld [vmem:[#allocation2 + $0x608] ss:$16 sps:$4 sm:$0xff]   ;;  %v4335_v5 = vld [vmem:[#allocation2 + $0xa44] ss:$16 sps:$4 sm:$0x3f]  }
 0x13a   :  { %2378 = vmatprep.subr.bf16.mxu0 %v4242_v26  ;;  %v4332_v26 = vld [vmem:[#allocation2 + $0x62c] ss:$16 sps:$4 sm:$0xff]  }
 0x13c   :  { %2551 = vmatpush1.bf16.msra.mxu1 %v4243_v51  ;;  %v4327_v51 = vld [vmem:[#allocation2 + $0xa20] ss:$16 sps:$4 sm:$0xff]  }
 0x13d   :  { %2379 = vmatpush1.bf16.msra.mxu0 %v4240_v27  ;;  %2552 = vmatprep.subr.bf16.mxu1 %v4251_v29  ;;  %v4552_v27 = vld [vmem:[%s4945_s0 + $0x10] ss:$44 sps:$4 sm:$0xff]  }
 0x13e   :  { %2380 = vmatprep.subr.bf16.mxu0 %v4248_v28  ;;  %v4330_v28 = vld [vmem:[#allocation2 + $0x628] ss:$16 sps:$4 sm:$0xff]   ;;  %v4333_v29 = vld [vmem:[#allocation2 + $0xa40] ss:$16 sps:$4 sm:$0x3f]  }
 0x140   :  { %2553 = vmatpush1.bf16.msra.mxu1 %v4249_v31  ;;  %v4338_v31 = vld [vmem:[#allocation2 + $0x64c] ss:$16 sps:$4 sm:$0xff]  }
 0x141   :  { %2381 = vmatpush1.bf16.msra.mxu0 %v4246_v30  ;;  %2554 = vmatprep.subr.bf16.mxu1 %v4257_v32  ;;  %v2192_v30 = vand.u32 %v4335_v5, %v4871_v16  ;;  %v4336_v32 = vld [vmem:[#allocation2 + $0x648] ss:$16 sps:$4 sm:$0xff]   ;;  %v4375_v5 = vld [vmem:[#allocation2 + $0x7cc] ss:$16 sps:$4 sm:$0xff]  }
 0x142   :  { %2382 = vmatprep.subr.bf16.mxu0 %v4254_v34  ;;  %v4706_v34 = vmov 0  }
 0x144   :  { %2555 = vmatpush1.bf16.msra.mxu1 %v4255_v35  ;;  %v4342_v35 = vld [vmem:[#allocation2 + $0x66c] ss:$16 sps:$4 sm:$0xff]  }
 0x145   :  { %2383 = vmatpush1.bf16.msra.mxu0 %v4252_v33  ;;  %2556 = vmatprep.subr.bf16.mxu1 %v4263_v37  ;;  %v2189_v33 = vand.u32 %v4333_v29, %v4871_v16  ;;  %v4339_v37 = vld [vmem:[%s4945_s0 + $0x28] ss:$44 sps:$4 sm:$0xff]   ;;  %v4378_v29 = vld [vmem:[#allocation2 + $0x7ec] ss:$16 sps:$4 sm:$0xff]  }
 0x146   :  { %2384 = vmatprep.subr.bf16.mxu0 %v4260_v36  ;;  %v4420_v36 = vld [vmem:[#allocation2 + $0xa0c] ss:$16 sps:$4 sm:$0xff]  }
 0x148   :  { %2557 = vmatpush1.bf16.msra.mxu1 %v4261_v39  ;;  %v4345_v39 = vld [vmem:[#allocation2 + $0x68c] ss:$16 sps:$4 sm:$0xff]  }
 0x149   :  { %2385 = vmatpush1.bf16.msra.mxu0 %v4258_v38  ;;  %2558 = vmatprep.subr.bf16.mxu1 %v4269_v41  ;;  %v4340_v38 = vld [vmem:[#allocation2 + $0x668] ss:$16 sps:$4 sm:$0xff]   ;;  %v4432_v41 = vld [vmem:[#allocation2 + $0xa4c] ss:$16 sps:$4 sm:$0x3f]  }
 0x14a   :  { %2386 = vmatprep.subr.bf16.mxu0 %v4266_v40  ;;  %v4418_v40 = vld [vmem:[#allocation2 + $0xa08] ss:$16 sps:$4 sm:$0xff]  }
 0x14c   :  { %2559 = vmatpush1.bf16.msra.mxu1 %v4267_v43  ;;  %v4424_v43 = vld [vmem:[#allocation2 + $0xa28] ss:$16 sps:$4 sm:$0xff]  }
 0x14d   :  { %2387 = vmatpush1.bf16.msra.mxu0 %v4264_v42  ;;  %2560 = vmatprep.subr.bf16.mxu1 %v4275_v45  ;;  %v4343_v42 = vld [vmem:[#allocation2 + $0x688] ss:$16 sps:$4 sm:$0xff]   ;;  %v4348_v45 = vld [vmem:[#allocation2 + $0x6ac] ss:$16 sps:$4 sm:$0xff]  }
 0x14e   :  { %2388 = vmatprep.subr.bf16.mxu0 %v4272_v44  ;;  %v4430_v44 = vld [vmem:[#allocation2 + $0xa48] ss:$16 sps:$4 sm:$0x3f]  }
 0x150   :  { %2561 = vmatpush1.bf16.msra.mxu1 %v4273_v47  ;;  %v4346_v47 = vld [vmem:[#allocation2 + $0x6a8] ss:$16 sps:$4 sm:$0xff]  }
 0x151   :  { %2389 = vmatpush1.bf16.msra.mxu0 %v4270_v46  ;;  %2562 = vmatprep.subr.bf16.mxu1 %v4281_v49  ;;  %v2198_v46 = vand.u32 %v4432_v41, %v4871_v16  ;;  %v4351_v49 = vld [vmem:[#allocation2 + $0x6cc] ss:$16 sps:$4 sm:$0xff]  }
 0x152   :  { %2390 = vmatprep.subr.bf16.mxu0 %v4278_v48  ;;  %v2195_v48 = vand.u32 %v4430_v44, %v4871_v16  ;;  %v4451_v16 = vld [vmem:[#allocation6 + $0x50] ss:$8 sps:$4 sm:$0xff]   ;;  %v4472_v44 = vld [vmem:[#allocation6 + $0xc0] ss:$8 sps:$4 sm:$0xff]  }
 0x153   :  { %v4469_v41 = vld [vmem:[#allocation6 + $0xb0] ss:$8 sps:$4 sm:$0xff]  }
 0x154   :  { %2563 = vmatpush1.bf16.msra.mxu1 %v4279_v52 }
 0x155   :  { %2391 = vmatpush1.bf16.msra.mxu0 %v4276_v50  ;;  %2564 = vmatprep.subr.bf16.mxu1 %v4287_v54  ;;  %v4438_v50 = vld [vmem:[#allocation6 + $0x4] ss:$8 sps:$4 sm:$0xff]  }
 0x156   :  { %2392 = vmatprep.subr.bf16.mxu0 %v4284_v53 }
 0x158   :  { %2565 = vmatpush1.bf16.msra.mxu1 %v4285_v56  ;;  %v4436_v56 = vld [vmem:[#allocation6] ss:$8 sps:$4 sm:$0xff]  }
 0x159   :  { %2393 = vmatpush1.bf16.msra.mxu0 %v4282_v55  ;;  %2566 = vmatprep.subr.bf16.mxu1 %v4293_v58  ;;  %v4349_v55 = vld [vmem:[#allocation2 + $0x6c8] ss:$16 sps:$4 sm:$0xff]   ;;  %v4354_v58 = vld [vmem:[#allocation2 + $0x6ec] ss:$16 sps:$4 sm:$0xff]  }
 0x15a   :  { %2394 = vmatprep.subr.bf16.mxu0 %v4290_v57 }
 0x15c   :  { %2567 = vmatpush1.bf16.msra.mxu1 %v4291_v60  ;;  %v4352_v60 = vld [vmem:[#allocation2 + $0x6e8] ss:$16 sps:$4 sm:$0xff]  }
 0x15d   :  { %2395 = vmatpush1.bf16.msra.mxu0 %v4288_v59  ;;  %2568 = vmatprep.subr.bf16.mxu1 %v4299_v62  ;;  %v4441_v59 = vld [vmem:[#allocation6 + $0x14] ss:$8 sps:$4 sm:$0xff]   ;;  %v4357_v62 = vld [vmem:[#allocation2 + $0x70c] ss:$16 sps:$4 sm:$0xff]  }
 0x15e   :  { %2396 = vmatprep.subr.bf16.mxu0 %v4296_v61  ;;  %v4439_v61 = vld [vmem:[#allocation6 + $0x10] ss:$8 sps:$4 sm:$0xff]  }
 0x160   :  { %2569 = vmatpush1.bf16.msra.mxu1 %v4297_v0  ;;  %v4355_v0 = vld [vmem:[#allocation2 + $0x708] ss:$16 sps:$4 sm:$0xff]  }
 0x161   :  { %2397 = vmatpush1.bf16.msra.mxu0 %v4294_v63  ;;  %2570 = vmatprep.subr.bf16.mxu1 %v4305_v2  ;;  %v4444_v63 = vld [vmem:[#allocation6 + $0x24] ss:$8 sps:$4 sm:$0xff]   ;;  %v4360_v2 = vld [vmem:[#allocation2 + $0x72c] ss:$16 sps:$4 sm:$0xff]  }
 0x162   :  { %2398 = vmatprep.subr.bf16.mxu0 %v4302_v1  ;;  %v4442_v1 = vld [vmem:[#allocation6 + $0x20] ss:$8 sps:$4 sm:$0xff]  }
 0x164   :  { %2571 = vmatpush1.bf16.msra.mxu1 %v4303_v6  ;;  %v4358_v6 = vld [vmem:[#allocation2 + $0x728] ss:$16 sps:$4 sm:$0xff]  }
 0x165   :  { %2399 = vmatpush1.bf16.msra.mxu0 %v4300_v3  ;;  %2572 = vmatprep.subr.bf16.mxu1 %v4311_v8  ;;  %v4447_v3 = vld [vmem:[#allocation6 + $0x34] ss:$8 sps:$4 sm:$0xff]   ;;  %v4363_v8 = vld [vmem:[#allocation2 + $0x74c] ss:$16 sps:$4 sm:$0xff]  }
 0x166   :  { %2400 = vmatprep.subr.bf16.mxu0 %v4308_v7  ;;  %v4445_v7 = vld [vmem:[#allocation6 + $0x30] ss:$8 sps:$4 sm:$0xff]  }
 0x168   :  { %2573 = vmatpush1.bf16.msra.mxu1 %v4309_v12  ;;  %v4366_v12 = vld [vmem:[#allocation2 + $0x76c] ss:$16 sps:$4 sm:$0xff]  }
 0x169   :  { %2401 = vmatpush1.bf16.msra.mxu0 %v4306_v11  ;;  %2574 = vmatprep.subr.bf16.mxu1 %v4317_v15  ;;  %v4448_v11 = vld [vmem:[#allocation6 + $0x40] ss:$8 sps:$4 sm:$0xff]   ;;  %v4364_v15 = vld [vmem:[#allocation2 + $0x768] ss:$16 sps:$4 sm:$0xff]  }
 0x16a   :  { %2402 = vmatprep.subr.bf16.mxu0 %v4314_v13  ;;  %v4453_v13 = vld [vmem:[#allocation6 + $0x54] ss:$8 sps:$4 sm:$0xff]  }
 0x16c   :  { %2575 = vmatpush1.bf16.msra.mxu1 %v4315_v18  ;;  %v4456_v18 = vld [vmem:[#allocation6 + $0x64] ss:$8 sps:$4 sm:$0xff]  }
 0x16d   :  { %2403 = vmatpush1.bf16.msra.mxu0 %v4312_v17  ;;  %2587 = vmatprep.subr.bf16.mxu1 %v4326_v4  ;;  %v4369_v17 = vld [vmem:[#allocation2 + $0x78c] ss:$16 sps:$4 sm:$0xff]  }
 0x16e   :  { %2415 = vmatprep.subr.bf16.mxu0 %v4323_v21  ;;  %v4367_v21 = vld [vmem:[#allocation2 + $0x788] ss:$16 sps:$4 sm:$0xff]   ;;  %v4454_v4 = vld [vmem:[#allocation6 + $0x60] ss:$8 sps:$4 sm:$0xff]  }
 0x16f   :  { %2577 = vmatmul.mubr.bf16.vlgmr.msra.gmra.mrb[4].mxu1 %v4552_v27  ;;  %v4462_v27 = vld [vmem:[#allocation6 + $0x84] ss:$8 sps:$4 sm:$0xff]  }
 0x170   :  { %2405 = vmatmul.mubr.bf16.vlgmr.msra.gmra.mrb[0].mxu0 %v4876_v22  ;;  %2588 = vmatpush1.bf16.msra.mxu1 %v4324_v24  ;;  %v4459_v24 = vld [vmem:[#allocation6 + $0x74] ss:$8 sps:$4 sm:$0xff]  }
 0x171   :  { %2416 = vmatpush1.bf16.msra.mxu0 %v4321_v23  ;;  %2589 = vmatprep.subr.bf16.mxu1 %v4332_v26  ;;  %v4372_v23 = vld [vmem:[#allocation2 + $0x7ac] ss:$16 sps:$4 sm:$0xff]  }
 0x172   :  { %2417 = vmatprep.subr.bf16.mxu0 %v4329_v25  ;;  %2447 = vmatprep.mubr.bf16.mxu0 %v4706_v34  ;;  %v4370_v25 = vld [vmem:[#allocation2 + $0x7a8] ss:$16 sps:$4 sm:$0xff]   ;;  %v4457_v26 = vld [vmem:[#allocation6 + $0x70] ss:$8 sps:$4 sm:$0xff]  }
 0x173   :  { %2619 = vmatprep.mubr.bf16.mxu1 %v4853_v19  ;;  %v4426_v19 = vld [vmem:[#allocation2 + $0xa2c] ss:$16 sps:$4 sm:$0xff]  }
 0x174   :  { %2590 = vmatpush1.bf16.msra.mxu1 %v4330_v28  ;;  %v4460_v28 = vld [vmem:[#allocation6 + $0x80] ss:$8 sps:$4 sm:$0xff]  }
 0x175   :  { %2418 = vmatpush1.bf16.msra.mxu0 %v4327_v51  ;;  %2591 = vmatprep.subr.bf16.mxu1 %v4338_v31  ;;  %v4373_v51 = vld [vmem:[#allocation2 + $0x7c8] ss:$16 sps:$4 sm:$0xff]  }
 0x176   :  { %2419 = vmatprep.subr.bf16.mxu0 %v2192_v30  ;;  %v4465_v30 = vld [vmem:[#allocation6 + $0x94] ss:$8 sps:$4 sm:$0xff]  }
 0x177   :  { %v4376_v31 = vld [vmem:[#allocation2 + $0x7e8] ss:$16 sps:$4 sm:$0xff]  }
 0x178   :  { %2592 = vmatpush1.bf16.msra.mxu1 %v4336_v32  ;;  %v4381_v32 = vld [vmem:[#allocation2 + $0x80c] ss:$16 sps:$4 sm:$0xff]  }
 0x179   :  { %2420 = vmatpush1.bf16.msra.mxu0 %v2189_v33  ;;  %2593 = vmatprep.subr.bf16.mxu1 %v4342_v35  ;;  %v4468_v33 = vld [vmem:[#allocation6 + $0xa4] ss:$8 sps:$4 sm:$0xff]  }
 0x17a   :  { %2673 = vmatprep.subr.bf16.mxu0 %v4420_v36  ;;  %v4379_v35 = vld [vmem:[#allocation2 + $0x808] ss:$16 sps:$4 sm:$0xff]   ;;  %v4384_v36 = vld [vmem:[#allocation2 + $0x82c] ss:$16 sps:$4 sm:$0xff]  }
 0x17c   :  { %3747 = vmatmul.mubr.msk.bf16.vlgmr.msra.gmra.mrb[0].mxu0 %vm2180_vm2, %v4339_v37  ;;  %2594 = vmatpush1.bf16.msra.mxu1 %v4340_v38  ;;  %v4471_v38 = vld [vmem:[#allocation6 + $0xb4] ss:$8 sps:$4 sm:$0xff]  }
 0x17d   :  { %2674 = vmatpush1.bf16.msra.mxu0 %v4418_v40  ;;  %2595 = vmatprep.subr.bf16.mxu1 %v4345_v39  ;;  %v4382_v39 = vld [vmem:[#allocation2 + $0x828] ss:$16 sps:$4 sm:$0xff]   ;;  %v4387_v40 = vld [vmem:[#allocation2 + $0x84c] ss:$16 sps:$4 sm:$0xff]  }
 0x17e   :  { %2675 = vmatprep.subr.bf16.mxu0 %v4426_v19  ;;  %2705 = vmatprep.mubr.bf16.mxu0 %v4706_v34  ;;  %v4463_v34 = vld [vmem:[#allocation6 + $0x90] ss:$8 sps:$4 sm:$0xff]   ;;  %v4474_v19 = vld [vmem:[#allocation6 + $0xc4] ss:$8 sps:$4 sm:$0xff]  }
 0x180   :  { %2596 = vmatpush1.bf16.msra.mxu1 %v4343_v42  ;;  %v4385_v42 = vld [vmem:[#allocation2 + $0x848] ss:$16 sps:$4 sm:$0xff]  }
 0x181   :  { %2676 = vmatpush1.bf16.msra.mxu0 %v4424_v43  ;;  %2597 = vmatprep.subr.bf16.mxu1 %v4348_v45  ;;  %v4390_v43 = vld [vmem:[#allocation2 + $0x86c] ss:$16 sps:$4 sm:$0xff]   ;;  %v4477_v45 = vld [vmem:[#allocation6 + $0xd4] ss:$8 sps:$4 sm:$0xff]  }
 0x182   :  { %2677 = vmatprep.subr.bf16.mxu0 %v2198_v46  ;;  %v4891_v52 = vpop.f32.mrb[0].mxu1  ;;  %v4393_v46 = vld [vmem:[#allocation2 + $0x88c] ss:$16 sps:$4 sm:$0xff]  }
 0x183   :  { %v4893_v53 = vpop.f32.mrb[1].mxu1 }
 0x184   :  { %v4895_v54 = vpop.f32.mrb[2].mxu1  ;;  %2598 = vmatpush1.bf16.msra.mxu1 %v4346_v47  ;;  %v4391_v47 = vld [vmem:[#allocation2 + $0x888] ss:$16 sps:$4 sm:$0xff]  }
 0x185   :  { %2678 = vmatpush1.bf16.msra.mxu0 %v2195_v48  ;;  %v4897_v57 = vpop.f32.mrb[3].mxu1  ;;  %2599 = vmatprep.subr.bf16.mxu1 %v4351_v49  ;;  %v4396_v48 = vld [vmem:[#allocation2 + $0x8ac] ss:$16 sps:$4 sm:$0xff]   ;;  %v4394_v49 = vld [vmem:[#allocation2 + $0x8a8] ss:$16 sps:$4 sm:$0xff]  }
 0x186   :  { %3124 = vmatprep.subr.bf16.mxu0 %v4438_v50  ;;  %v4399_v50 = vld [vmem:[#allocation2 + $0x8cc] ss:$16 sps:$4 sm:$0xff]  }
 0x188   :  { %3748 = vmatmul.mubr.msk.bf16.vlgmr.msra.gmra.mrb[4].mxu0 %vm2180_vm2, %v4339_v37  ;;  %2600 = vmatpush1.bf16.msra.mxu1 %v4349_v55  ;;  %v4466_v37 = vld [vmem:[#allocation6 + $0xa0] ss:$8 sps:$4 sm:$0xff]   ;;  %v4397_v55 = vld [vmem:[#allocation2 + $0x8c8] ss:$16 sps:$4 sm:$0xff]  }
 0x189   :  { %3125 = vmatpush1.bf16.msra.mxu0 %v4436_v56  ;;  %2601 = vmatprep.subr.bf16.mxu1 %v4354_v58  ;;  %v4402_v56 = vld [vmem:[#allocation2 + $0x8ec] ss:$16 sps:$4 sm:$0xff]   ;;  %v4400_v58 = vld [vmem:[#allocation2 + $0x8e8] ss:$16 sps:$4 sm:$0xff]  }
 0x18a   :  { %3126 = vmatprep.subr.bf16.mxu0 %v4441_v59  ;;  %v4405_v59 = vld [vmem:[#allocation2 + $0x90c] ss:$16 sps:$4 sm:$0xff]  }
 0x18c   :  { %2602 = vmatpush1.bf16.msra.mxu1 %v4352_v60  ;;  %v4403_v60 = vld [vmem:[#allocation2 + $0x908] ss:$16 sps:$4 sm:$0xff]  }
 0x18d   :  { %3127 = vmatpush1.bf16.msra.mxu0 %v4439_v61  ;;  %2603 = vmatprep.subr.bf16.mxu1 %v4357_v62  ;;  %v4408_v61 = vld [vmem:[#allocation2 + $0x92c] ss:$16 sps:$4 sm:$0xff]   ;;  %v4480_v62 = vld [vmem:[#allocation6 + $0xe4] ss:$8 sps:$4 sm:$0xff]  }
 0x18e   :  { %3128 = vmatprep.subr.bf16.mxu0 %v4444_v63  ;;  %v4406_v63 = vld [vmem:[#allocation2 + $0x928] ss:$16 sps:$4 sm:$0xff]  }
 0x190   :  { %2604 = vmatpush1.bf16.msra.mxu1 %v4355_v0  ;;  %v4478_v0 = vld [vmem:[#allocation6 + $0xe0] ss:$8 sps:$4 sm:$0xff]  }
 0x191   :  { %3129 = vmatpush1.bf16.msra.mxu0 %v4442_v1  ;;  %2605 = vmatprep.subr.bf16.mxu1 %v4360_v2  ;;  %v4411_v1 = vld [vmem:[#allocation2 + $0x94c] ss:$16 sps:$4 sm:$0xff]   ;;  %v4483_v2 = vld [vmem:[#allocation6 + $0xf4] ss:$8 sps:$4 sm:$0xff]  }
 0x192   :  { %3130 = vmatprep.subr.bf16.mxu0 %v4447_v3  ;;  %v4409_v3 = vld [vmem:[#allocation2 + $0x948] ss:$16 sps:$4 sm:$0xff]  }
 0x194   :  { %2606 = vmatpush1.bf16.msra.mxu1 %v4358_v6  ;;  %v4481_v6 = vld [vmem:[#allocation6 + $0xf0] ss:$8 sps:$4 sm:$0xff]  }
 0x195   :  { %3131 = vmatpush1.bf16.msra.mxu0 %v4445_v7  ;;  %2607 = vmatprep.subr.bf16.mxu1 %v4363_v8  ;;  %v4414_v7 = vld [vmem:[#allocation2 + $0x96c] ss:$16 sps:$4 sm:$0xff]   ;;  %v4412_v8 = vld [vmem:[#allocation2 + $0x968] ss:$16 sps:$4 sm:$0xff]  }
 0x196   :  { %3132 = vmatprep.subr.bf16.mxu0 %v4450_v9  ;;  %v4417_v9 = vld [vmem:[#allocation2 + $0x98c] ss:$16 sps:$4 sm:$0xff]  }
 0x198   :  { %2608 = vmatpush1.bf16.msra.mxu1 %v4361_v10  ;;  %v4486_v10 = vld [vmem:[#allocation6 + $0x104] ss:$8 sps:$4 sm:$0xff]  }
 0x199   :  { %3133 = vmatpush1.bf16.msra.mxu0 %v4448_v11  ;;  %2609 = vmatprep.subr.bf16.mxu1 %v4366_v12  ;;  %v4415_v11 = vld [vmem:[#allocation2 + $0x988] ss:$16 sps:$4 sm:$0xff]   ;;  %v4423_v12 = vld [vmem:[#allocation2 + $0x9ac] ss:$16 sps:$4 sm:$0xff]  }
 0x19a   :  { %3134 = vmatprep.subr.bf16.mxu0 %v4453_v13  ;;  %v4421_v13 = vld [vmem:[#allocation2 + $0x9a8] ss:$16 sps:$4 sm:$0xff]  }
 0x19c   :  { %2610 = vmatpush1.bf16.msra.mxu1 %v4364_v15  ;;  %v4429_v15 = vld [vmem:[#allocation2 + $0x9cc] ss:$16 sps:$4 sm:$0xff]  }
 0x19d   :  { %3135 = vmatpush1.bf16.msra.mxu0 %v4451_v16  ;;  %2611 = vmatprep.subr.bf16.mxu1 %v4369_v17  ;;  %v4427_v16 = vld [vmem:[#allocation2 + $0x9c8] ss:$16 sps:$4 sm:$0xff]   ;;  %v4435_v17 = vld [vmem:[#allocation2 + $0x9ec] ss:$16 sps:$4 sm:$0xff]  }
 0x19e   :  { %3136 = vmatprep.subr.bf16.mxu0 %v4456_v18  ;;  %v4433_v18 = vld [vmem:[#allocation2 + $0x9e8] ss:$16 sps:$4 sm:$0xff]  }
 0x1a0   :  { %2612 = vmatpush1.bf16.msra.mxu1 %v4367_v21  ;;  %v449_v21 = vlaneseq }
 0x1a1   :  { %3137 = vmatpush1.bf16.msra.mxu0 %v4454_v4  ;;  %2613 = vmatprep.subr.bf16.mxu1 %v4372_v23 }
 0x1a2   :  { %3138 = vmatprep.subr.bf16.mxu0 %v4459_v24  ;;  %v4903_v4 = vshrl.u32 %v449_v21, 7  ;;  %v4906_v24 = vld [vmem:[#allocation4] sm:$0xf]  ;;  %v4520_v21 = vld [vmem:[#allocation6 + $0x1c0] ss:$8 sps:$4 sm:$0xff]  }
 0x1a4   :  { %2614 = vmatpush1.bf16.msra.mxu1 %v4370_v25  ;;  %v451_v23 = vsub.s32 0, %v4903_v4  ;;  %v455_v25 = vsub.s32 1, %v4903_v4 }
 0x1a5   :  { %3139 = vmatpush1.bf16.msra.mxu0 %v4457_v26  ;;  %2615 = vmatprep.subr.bf16.mxu1 %v4375_v5 }
 0x1a6   :  { %3140 = vmatprep.subr.bf16.mxu0 %v4462_v27  ;;  %v452_v26 = vrot.slane %v4906_v24, %v451_v23  ;;  %v456_v5 = vrot.slane %v4906_v24, %v455_v25 }
 0x1a8   :  { %2616 = vmatpush1.bf16.msra.mxu1 %v4373_v51  ;;  %v2235_v27 = vadd.f32 %v4891_v52, %v452_v26  ;;  %v4535_v52 = vld [vmem:[#allocation9 + $0x8] sm:$0xff]  }
 0x1a9   :  { %3141 = vmatpush1.bf16.msra.mxu0 %v4460_v28  ;;  %2617 = vmatprep.subr.bf16.mxu1 %v4378_v29  ;;  %v2239_v28 = vadd.f32 %v4895_v54, %v452_v26  ;;  %v4525_v26 = vld [vmem:[#allocation6 + $0x1d4] ss:$8 sps:$4 sm:$0xff]  }
 0x1aa   :  { %3142 = vmatprep.subr.bf16.mxu0 %v4465_v30 }
 0x1ac   :  { %2618 = vmatpush1.bf16.msra.mxu1 %v4376_v31  ;;  %v4532_v31 = vld [vmem:[#allocation9 + $0x40] sm:$0xff]  }
 0x1ad   :  { %3143 = vmatpush1.bf16.msra.mxu0 %v4463_v34  ;;  %2630 = vmatprep.subr.bf16.mxu1 %v4381_v32  ;;  %v4533_v34 = vld [vmem:[#allocation9] sm:$0xff]   ;;  %v4534_v32 = vld [vmem:[#allocation9 + $0x48] sm:$0xff]  }
 0x1ae   :  { %3144 = vmatprep.subr.bf16.mxu0 %v4468_v33  ;;  %v2241_v33 = vadd.f32 %v4897_v57, %v456_v5  ;;  %v4489_v57 = vld [vmem:[#allocation6 + $0x114] ss:$8 sps:$4 sm:$0xff]  }
 0x1af   :  { %2620 = vmatmul.mubr.bf16.vlgmr.msra.gmra.mrb[4].mxu1 %v4860_v14  ;;  %v4388_v14 = vld [vmem:[#allocation2 + $0x868] ss:$16 sps:$4 sm:$0xff]  }
 0x1b0   :  { %2631 = vmatpush1.bf16.msra.mxu1 %v4379_v35  ;;  %2662 = vmatprep.mubr.bf16.mxu1 %v4865_v20  ;;  %v4475_v20 = vld [vmem:[#allocation6 + $0xd0] ss:$8 sps:$4 sm:$0xff]  }
 0x1b1   :  { %2632 = vmatprep.subr.bf16.mxu1 %v4384_v36  ;;  %3145 = vmatpush1.bf16.msra.mxu0 %v4466_v37 }
 0x1b2   :  { %3146 = vmatprep.subr.bf16.mxu0 %v4471_v38 }
 0x1b4   :  { %2633 = vmatpush1.bf16.msra.mxu1 %v4382_v39 }
 0x1b5   :  { %2634 = vmatprep.subr.bf16.mxu1 %v4387_v40  ;;  %3147 = vmatpush1.bf16.msra.mxu0 %v4469_v41  ;;  %v4536_v41 = vld [vmem:[#allocation9 + $0x50] sm:$0xff]  }
 0x1b6   :  { %3148 = vmatprep.subr.bf16.mxu0 %v4474_v19 }
 0x1b8   :  { %2635 = vmatpush1.bf16.msra.mxu1 %v4385_v42 }
 0x1b9   :  { %2636 = vmatprep.subr.bf16.mxu1 %v4390_v43  ;;  %3149 = vmatpush1.bf16.msra.mxu0 %v4472_v44  ;;  %v4484_v44 = vld [vmem:[#allocation6 + $0x100] ss:$8 sps:$4 sm:$0xff]  }
 0x1ba   :  { %3150 = vmatprep.subr.bf16.mxu0 %v4477_v45  ;;  %v4537_v45 = vld [vmem:[#allocation9 + $0x10] sm:$0xff]  }
 0x1bc   :  { %2637 = vmatpush1.bf16.msra.mxu1 %v4388_v14  ;;  %v4538_v14 = vld [vmem:[#allocation9 + $0x58] sm:$0xff]  }
 0x1bd   :  { %2638 = vmatprep.subr.bf16.mxu1 %v4393_v46  ;;  %3151 = vmatpush1.bf16.msra.mxu0 %v4475_v20  ;;  %v4487_v46 = vld [vmem:[#allocation6 + $0x110] ss:$8 sps:$4 sm:$0xff]  }
 0x1be   :  { %3152 = vmatprep.subr.bf16.mxu0 %v4480_v62  ;;  %v4493_v62 = vld [vmem:[#allocation6 + $0x130] ss:$8 sps:$4 sm:$0xff]  }
 0x1c0   :  { %2639 = vmatpush1.bf16.msra.mxu1 %v4391_v47  ;;  %v4539_v47 = vld [vmem:[#allocation9 + $0x18] sm:$0xff]  }
 0x1c1   :  { %2640 = vmatprep.subr.bf16.mxu1 %v4396_v48  ;;  %3153 = vmatpush1.bf16.msra.mxu0 %v4478_v0  ;;  %v4492_v48 = vld [vmem:[#allocation6 + $0x124] ss:$8 sps:$4 sm:$0xff]   ;;  %v4496_v0 = vld [vmem:[#allocation6 + $0x140] ss:$8 sps:$4 sm:$0xff]  }
 0x1c2   :  { %3154 = vmatprep.subr.bf16.mxu0 %v4483_v2  ;;  %v4499_v2 = vld [vmem:[#allocation6 + $0x150] ss:$8 sps:$4 sm:$0xff]  }
 0x1c4   :  { %2641 = vmatpush1.bf16.msra.mxu1 %v4394_v49 }
 0x1c5   :  { %2642 = vmatprep.subr.bf16.mxu1 %v4399_v50  ;;  %3155 = vmatpush1.bf16.msra.mxu0 %v4481_v6  ;;  %v4540_v50 = vld [vmem:[#allocation9 + $0x60] sm:$0xff]  }
 0x1c6   :  { %3167 = vmatprep.subr.bf16.mxu0 %v4486_v10  ;;  %v4502_v6 = vld [vmem:[#allocation6 + $0x160] ss:$8 sps:$4 sm:$0xff]  }
 0x1c7   :  { %v4508_v10 = vld [vmem:[#allocation6 + $0x180] ss:$8 sps:$4 sm:$0xff]  }
 0x1c8   :  { %2643 = vmatpush1.bf16.msra.mxu1 %v4397_v55 }
 0x1c9   :  { %2644 = vmatprep.subr.bf16.mxu1 %v4402_v56 }
 0x1cc   :  { %2645 = vmatpush1.bf16.msra.mxu1 %v4400_v58  ;;  %v4490_v58 = vld [vmem:[#allocation6 + $0x120] ss:$8 sps:$4 sm:$0xff]  }
 0x1cd   :  { %2646 = vmatprep.subr.bf16.mxu1 %v4405_v59  ;;  %v4541_v59 = vld [vmem:[#allocation9 + $0x20] sm:$0xff]  }
 0x1d0   :  { %2647 = vmatpush1.bf16.msra.mxu1 %v4403_v60  ;;  %v4495_v60 = vld [vmem:[#allocation6 + $0x134] ss:$8 sps:$4 sm:$0xff]  }
 0x1d1   :  { %2648 = vmatprep.subr.bf16.mxu1 %v4408_v61  ;;  %v4542_v61 = vld [vmem:[#allocation9 + $0x68] sm:$0xff]  }
 0x1d4   :  { %2649 = vmatpush1.bf16.msra.mxu1 %v4406_v63  ;;  %v4498_v63 = vld [vmem:[#allocation6 + $0x144] ss:$8 sps:$4 sm:$0xff]  }
 0x1d5   :  { %2650 = vmatprep.subr.bf16.mxu1 %v4411_v1  ;;  %v4501_v1 = vld [vmem:[#allocation6 + $0x154] ss:$8 sps:$4 sm:$0xff]  }
 0x1d8   :  { %2651 = vmatpush1.bf16.msra.mxu1 %v4409_v3  ;;  %v4504_v3 = vld [vmem:[#allocation6 + $0x164] ss:$8 sps:$4 sm:$0xff]  }
 0x1d9   :  { %2652 = vmatprep.subr.bf16.mxu1 %v4414_v7  ;;  %v4507_v7 = vld [vmem:[#allocation6 + $0x174] ss:$8 sps:$4 sm:$0xff]  }
 0x1dc   :  { %2653 = vmatpush1.bf16.msra.mxu1 %v4412_v8  ;;  %v4505_v8 = vld [vmem:[#allocation6 + $0x170] ss:$8 sps:$4 sm:$0xff]  }
 0x1dd   :  { %2654 = vmatprep.subr.bf16.mxu1 %v4417_v9  ;;  %v4510_v9 = vld [vmem:[#allocation6 + $0x184] ss:$8 sps:$4 sm:$0xff]  }
 0x1e0   :  { %2655 = vmatpush1.bf16.msra.mxu1 %v4415_v11  ;;  %v4513_v11 = vld [vmem:[#allocation6 + $0x194] ss:$8 sps:$4 sm:$0xff]  }
 0x1e1   :  { %2656 = vmatprep.subr.bf16.mxu1 %v4423_v12  ;;  %v4511_v12 = vld [vmem:[#allocation6 + $0x190] ss:$8 sps:$4 sm:$0xff]  }
 0x1e4   :  { %2657 = vmatpush1.bf16.msra.mxu1 %v4421_v13  ;;  %v4516_v13 = vld [vmem:[#allocation6 + $0x1a4] ss:$8 sps:$4 sm:$0xff]  }
 0x1e5   :  { %2658 = vmatprep.subr.bf16.mxu1 %v4429_v15  ;;  %v4514_v15 = vld [vmem:[#allocation6 + $0x1a0] ss:$8 sps:$4 sm:$0xff]  }
 0x1e8   :  { %2659 = vmatpush1.bf16.msra.mxu1 %v4427_v16  ;;  %v4519_v16 = vld [vmem:[#allocation6 + $0x1b4] ss:$8 sps:$4 sm:$0xff]  }
 0x1e9   :  { %2660 = vmatprep.subr.bf16.mxu1 %v4435_v17  ;;  %v4517_v17 = vld [vmem:[#allocation6 + $0x1b0] ss:$8 sps:$4 sm:$0xff]  }
 0x1ec   :  { %2661 = vmatpush1.bf16.msra.mxu1 %v4433_v18  ;;  %v4522_v18 = vld [vmem:[#allocation6 + $0x1c4] ss:$8 sps:$4 sm:$0xff]  }
 0x1ed   :  { %3830 = vmatprep.subr.bf16.mxu1 %v4532_v31 }
 0x1ef   :  { %2663 = vmatmul.mubr.bf16.vlgmr.msra.gmra.mrb[4].mxu1 %v4876_v22  ;;  %v2237_v22 = vadd.f32 %v4893_v53, %v456_v5  ;;  %v4523_v5 = vld [vmem:[#allocation6 + $0x1d0] ss:$8 sps:$4 sm:$0xff]  }
 0x1f0   :  { %3831 = vmatpush3.bf16.msra.mxu1 %v4533_v34 }
 0x1f1   :  { %3832 = vmatprep.subr.bf16.mxu1 %v4534_v32 }
 0x1f4   :  { %3833 = vmatpush3.bf16.msra.mxu1 %v4535_v52 }
 0x1f5   :  { %3834 = vmatprep.subr.bf16.mxu1 %v4536_v41 }
 0x1f8   :  { %3835 = vmatpush3.bf16.msra.mxu1 %v4537_v45 }
 0x1f9   :  { %3836 = vmatprep.subr.bf16.mxu1 %v4538_v14  ;;  %v4544_v14 = vld [vmem:[#allocation9 + $0x70] sm:$0xff]  }
 0x1fc   :  { %3837 = vmatpush3.bf16.msra.mxu1 %v4539_v47  ;;  %v4547_v47 = vld [vmem:[#allocation9 + $0x38] sm:$0xff]  }
 0x1fd   :  { %3838 = vmatprep.subr.bf16.mxu1 %v4540_v50 }
 0x200   :  { %3839 = vmatpush3.bf16.msra.mxu1 %v4541_v59 }
 0x201   :  { %3840 = vmatprep.subr.bf16.mxu1 %v4542_v61 }
 0x24f   :  { %v2449_v51 = vpop.f32.mrb[0].mxu0 }
 0x250   :  { %v3853_v29 = vadd.f32 %v2449_v51, %v2235_v27  ;;  %v2451_v30 = vpop.f32.mrb[1].mxu0  ;;  %v4528_v27 = vld [vmem:[#allocation6 + $0x1e4] ss:$8 sps:$4 sm:$0xff]   ;;  %v4531_v51 = vld [vmem:[#allocation6 + $0x1f4] ss:$8 sps:$4 sm:$0xff]  }
 0x251   :  { %v3855_v35 = vadd.f32 %v2451_v30, %v2237_v22  ;;  %v2453_v36 = vpop.f32.mrb[2].mxu0  ;;  %v4526_v22 = vld [vmem:[#allocation6 + $0x1e0] ss:$8 sps:$4 sm:$0xff]   ;;  %v463_v30 = vsub.s32 3, %v4903_v4 }
 0x252   :  { %v3857_v37 = vadd.f32 %v2453_v36, %v2239_v28  ;;  %v2455_v38 = vpop.f32.mrb[3].mxu0  ;;  %v2716_v40 = vmax.f32 %v3853_v29, 0.0  ;;  %v4529_v28 = vld [vmem:[#allocation6 + $0x1f0] ss:$8 sps:$4 sm:$0xff]   ;;  %v459_v29 = vsub.s32 2, %v4903_v4 }
 0x253   :  { %v3859_v39 = vadd.f32 %v2455_v38, %v2241_v33  ;;  %v2717_v54 = vmax.f32 %v3855_v35, 0.0  ;;  %v464_v34 = vrot.slane %v4906_v24, %v463_v30 }
 0x254   :  { %v2720_v53 = vmax.f32 %v3857_v37, 0.0  ;;  %v460_v31 = vrot.slane %v4906_v24, %v459_v29 }
 0x255   :  { %v2721_v19 = vmax.f32 %v3859_v39, 0.0 }
 0x256   :  { %v2724_v42 = vpack.c.bf16 %v2720_v53, %v2716_v40 }
 0x257   :  { %v2725_v43 = vpack.c.bf16 %v2721_v19, %v2717_v54 }
 0x259   :  { %3156 = vmatprep.mubr.bf16.mxu0 %v2725_v43 }
 0x25a   :  { %3157 = vmatmul.mubr.bf16.vlgmr.msra.gmra.mrb[8].mxu0 %v2724_v42 }
 0x25b   :  { %3168 = vmatpush1.bf16.msra.mxu0 %v4484_v44  ;;  %v4919_v20 = vpop.f32.mrb[4].mxu0 }
 0x25c   :  { %3169 = vmatprep.subr.bf16.mxu0 %v4489_v57  ;;  %v4921_v49 = vpop.f32.mrb[5].mxu0  ;;  %v4543_v57 = vld [vmem:[#allocation9 + $0x28] sm:$0xff]  }
 0x25d   :  { %v4923_v55 = vpop.f32.mrb[6].mxu0  ;;  %3841 = vmatpush3.bf16.msra.mxu1 %v4543_v57 }
 0x25e   :  { %v4925_v56 = vpop.f32.mrb[7].mxu0  ;;  %3842 = vmatprep.subr.bf16.mxu1 %v4544_v14 }
 0x25f   :  { %3170 = vmatpush1.bf16.msra.mxu0 %v4487_v46  ;;  %v4545_v46 = vld [vmem:[#allocation9 + $0x30] sm:$0xff]  }
 0x260   :  { %3171 = vmatprep.subr.bf16.mxu0 %v4492_v48  ;;  %v2792_v48 = vld [vmem:[#allocation7] sm:$0x3] }
 0x261   :  { %3843 = vmatpush3.bf16.msra.mxu1 %v4545_v46  ;;  %v2801_v50 = vrot.slane %v2792_v48, %v455_v25 }
 0x263   :  { %3172 = vmatpush1.bf16.msra.mxu0 %v4490_v58 }
 0x264   :  { %3173 = vmatprep.subr.bf16.mxu0 %v4495_v60 }
 0x267   :  { %3174 = vmatpush1.bf16.msra.mxu0 %v4493_v62 }
 0x268   :  { %3175 = vmatprep.subr.bf16.mxu0 %v4498_v63 }
 0x26b   :  { %3176 = vmatpush1.bf16.msra.mxu0 %v4496_v0 }
 0x26c   :  { %3177 = vmatprep.subr.bf16.mxu0 %v4501_v1 }
 0x26f   :  { %3178 = vmatpush1.bf16.msra.mxu0 %v4499_v2 }
 0x270   :  { %3179 = vmatprep.subr.bf16.mxu0 %v4504_v3 }
 0x273   :  { %3180 = vmatpush1.bf16.msra.mxu0 %v4502_v6 }
 0x274   :  { %3181 = vmatprep.subr.bf16.mxu0 %v4507_v7 }
 0x277   :  { %3182 = vmatpush1.bf16.msra.mxu0 %v4505_v8  ;;  %v3813_v8 = vld [vmem:[#allocation10] ss:$0 sm:$0xff] }
 0x278   :  { %3183 = vmatprep.subr.bf16.mxu0 %v4510_v9 }
 0x27b   :  { %3184 = vmatpush1.bf16.msra.mxu0 %v4508_v10 }
 0x27c   :  { %3185 = vmatprep.subr.bf16.mxu0 %v4513_v11 }
 0x27f   :  { %3186 = vmatpush1.bf16.msra.mxu0 %v4511_v12 }
 0x280   :  { %3187 = vmatprep.subr.bf16.mxu0 %v4516_v13 }
 0x283   :  { %3188 = vmatpush1.bf16.msra.mxu0 %v4514_v15 }
 0x284   :  { %3189 = vmatprep.subr.bf16.mxu0 %v4519_v16 }
 0x287   :  { %3190 = vmatpush1.bf16.msra.mxu0 %v4517_v17 }
 0x288   :  { %3191 = vmatprep.subr.bf16.mxu0 %v4522_v18 }
 0x28b   :  { %3192 = vmatpush1.bf16.msra.mxu0 %v4520_v21 }
 0x28c   :  { %3193 = vmatprep.subr.bf16.mxu0 %v4525_v26 }
 0x28f   :  { %3194 = vmatpush1.bf16.msra.mxu0 %v4523_v5 }
 0x290   :  { %3195 = vmatprep.subr.bf16.mxu0 %v4528_v27 }
 0x293   :  { %3196 = vmatpush1.bf16.msra.mxu0 %v4526_v22 }
 0x294   :  { %3197 = vmatprep.subr.bf16.mxu0 %v4531_v51 }
 0x297   :  { %3198 = vmatpush1.bf16.msra.mxu0 %v4529_v28 }
 0x2c2   :  { %v2664_v32 = vpop.f32.mrb[4].mxu1 }
 0x2c3   :  { %v3860_v33 = vadd.f32 %v2664_v32, %v460_v31  ;;  %v2666_v35 = vpop.f32.mrb[5].mxu1 }
 0x2c4   :  { %v3862_v36 = vadd.f32 %v2666_v35, %v464_v34  ;;  %v2668_v37 = vpop.f32.mrb[6].mxu1 }
 0x2c5   :  { %v3861_v38 = vadd.f32 %v3860_v33, %v4919_v20  ;;  %v3864_v39 = vadd.f32 %v2668_v37, %v460_v31  ;;  %v2670_v52 = vpop.f32.mrb[7].mxu1  ;;  %v4546_v20 = vld [vmem:[#allocation9 + $0x78] sm:$0xff]  }
 0x2c6   :  { %v3863_v40 = vadd.f32 %v3862_v36, %v4921_v49  ;;  %v3866_v53 = vadd.f32 %v2670_v52, %v464_v34  ;;  %3844 = vmatprep.subr.bf16.mxu1 %v4546_v20  ;;  %v2797_v49 = vrot.slane %v2792_v48, %v451_v23 }
 0x2c7   :  { %v3865_v41 = vadd.f32 %v3864_v39, %v4923_v55  ;;  %v2718_v19 = vmax.f32 %v3861_v38, 0.0  ;;  %3845 = vmatpush3.bf16.msra.mxu1 %v4547_v47 }
 0x2c8   :  { %v3867_v54 = vadd.f32 %v3866_v53, %v4925_v56  ;;  %v2719_v43 = vmax.f32 %v3863_v40, 0.0 }
 0x2c9   :  { %v2722_v42 = vmax.f32 %v3865_v41, 0.0 }
 0x2ca   :  { %v2723_v24 = vmax.f32 %v3867_v54, 0.0 }
 0x2cb   :  { %v2726_v44 = vpack.c.bf16 %v2722_v42, %v2718_v19 }
 0x2cc   :  { %v2727_v45 = vpack.c.bf16 %v2723_v24, %v2719_v43 }
 0x2ce   :  { %3199 = vmatprep.mubr.bf16.mxu0 %v2727_v45 }
 0x2cf   :  { %3200 = vmatmul.mubr.bf16.vlgmr.msra.gmra.mrb[8].mxu0 %v2726_v44 }
 0x3a2   :  { %v3201_v55 = vpop.f32.mrb[8].mxu0 }
 0x3a3   :  { %v3868_v56 = vadd.f32 %v3201_v55, %v2797_v49  ;;  %v3203_v58 = vpop.f32.mrb[9].mxu0 }
 0x3a4   :  { %v3869_v59 = vadd.f32 %v3203_v58, %v2801_v50  ;;  %v3205_v60 = vpop.f32.mrb[10].mxu0 }
 0x3a5   :  { %v3870_v61 = vadd.f32 %v3205_v60, %v2797_v49  ;;  %v3207_v62 = vpop.f32.mrb[11].mxu0  ;;  %v3210_v0 = vmax.f32 %v3868_v56, 0.0 }
 0x3a6   :  { %v3871_v63 = vadd.f32 %v3207_v62, %v2801_v50  ;;  %v3211_v2 = vmax.f32 %v3869_v59, 0.0 }
 0x3a7   :  { %v3212_v1 = vmax.f32 %v3870_v61, 0.0 }
 0x3a8   :  { %v3213_v3 = vmax.f32 %v3871_v63, 0.0 }
 0x3a9   :  { %v3214_v6 = vpack.c.bf16 %v3212_v1, %v3210_v0 }
 0x3aa   :  { %v3215_v7 = vpack.c.bf16 %v3213_v3, %v3211_v2 }
 0x3ac   :  { %3383 = vmatprep.mubr.bf16.mxu1 %v3215_v7 }
 0x3ad   :  { %3384 = vmatmul.mubr.bf16.vlgmr.msra.gmra.mrb[8].mxu1 %v3214_v6 }
 0x480   :  { %v3846_v23 = vpop.f32.mrb[8].mxu1 }
 0x481   :  { %v3847_v4 = vpop.f32.mrb[9].mxu1 }
 0x482   :  { %v3848_v25 = vadd.f32 %v3847_v4, %v3846_v23  ;;  %v3849_v9 = vpop.f32.mrb[10].mxu1 }
 0x483   :  { %v3850_v10 = vpop.f32.mrb[11].mxu1 }
 0x484   :  { %v3386_v11 = vadd.f32 %v3848_v25, %v3813_v8  ;;  %v3851_v12 = vadd.f32 %v3850_v10, %v3849_v9 }
 0x486   :  { %4548 = vtanh.f32 %v3386_v11  ;;  %v3389_v13 = vadd.f32 %v3851_v12, %v3813_v8 }
 0x488   :  { %4550 = vtanh.f32 %v3389_v13 }
 0x490   :  { %v4549_v15 = vpop.eup %4548 }
 0x491   :  { %3394 = vst [vmem:[%s4952_s7] sm:$0xff] %v4549_v15 }
 0x492   :  { %v4551_v16 = vpop.eup %4550 }
 0x493   :  { %3395 = vst [vmem:[%s4952_s7 + $0x8] sm:$0xff] %v4551_v16 }
 0x494   :  { %3400 = vsyncpa [#allocation3], 1 }
 0x495   :  { %3401 = vsyncpa [#allocation5], 1 }
 0x496   :  { %3402 = vsyncpa [#allocation8], 1 }
 0x497   :  { %3403 = vsyncpa [#allocation11], 1 }

</bundles_post_ra>
